<compile_context>
chip_gen: v7x
topology: tpu7x:2x2x1
jax: 0.10.0
libtpu: 0.0.40
codegen_flags: <defaults>
</compile_context>

<pallas_src>
import functools

import numpy as np
import jax
import jax.numpy as jnp
from jax import lax
from jax.experimental import pallas as pl
from jax.experimental.pallas import tpu as pltpu

LEAKY_SLOPE = 0.01   # nn.LeakyReLU() default negative_slope


# ----------------------------------------------------------------------------
# Pallas kernel: `batch_tile` batch elements (all groups) per grid step.
# ----------------------------------------------------------------------------
def _fgs_kernel(feat_ref, d2r_ref, d2i_ref, id2r_ref, id2i_ref,
                onehot_ref, onehotT_ref, b2g_ref, g2b_ref,
                fcwT_ref, fcb_ref, gamma_ref, out_ref,
                *, bt, group, K, HW, mxu_dtype):
    f32 = jnp.float32
    M = bt * group                                           # rows = (batch, group)

    feat = feat_ref[...]                                     # (bt, C, HW) lane-dense
    feat3 = feat.reshape(M, K, HW)                           # b-major rows

    # ChannelPool(['avg','max']): mean over channels + max over channels.
    pooled = jnp.mean(feat3, axis=1) + jnp.max(feat3, axis=1)        # (M, HW)

    # --- fftshift(fft2(.)) : combined (HW,HW) 2-D DFT matrix, two matmuls ----
    p = pooled.astype(mxu_dtype)
    Fr = jnp.dot(p, d2r_ref[...], preferred_element_type=f32)        # (M, HW)
    Fi = jnp.dot(p, d2i_ref[...], preferred_element_type=f32)

    amp = jnp.sqrt(Fr * Fr + Fi * Fi)                                # (M, HW)

    # --- radial band sums; 1/count is folded into the fc weight rows ---------
    band = jnp.dot(amp.astype(mxu_dtype), onehot_ref[...],
                   preferred_element_type=f32)                       # (M, LP)

    # --- per-group fc: Linear + LeakyReLU, batched over the group axis -------
    if bt > 1:   # b-major -> g-major rows via a tiny constant permutation matmul
        band = jnp.dot(b2g_ref[...], band, preferred_element_type=f32)
    band3 = band.reshape(group, bt, -1)                              # (g, bt, LP)
    z3 = lax.dot_general(band3, fcwT_ref[...],
                         dimension_numbers=(((2,), (1,)), ((0,), (0,))),
                         preferred_element_type=f32)                 # (g, bt, LP)
    z3 = z3 + fcb_ref[...]                                           # (g, 1, LP) bcast
    att3 = jnp.where(z3 >= 0, z3, LEAKY_SLOPE * z3)
    att = att3.reshape(M, -1)
    if bt > 1:   # back to b-major
        att = jnp.dot(g2b_ref[...], att, preferred_element_type=f32)

    # --- scatter band attention back onto the spectrum (plain MXU matmul) ----
    # scale[m, p] = att[m, labels[p]]
    scale = jnp.dot(att.astype(mxu_dtype), onehotT_ref[...],
                    preferred_element_type=f32)                      # (M, HW)
    Mr = scale * Fr
    Mi = scale * Fi

    # --- real(ifft2(ifftshift(.))) : combined inverse DFT, two matmuls -------
    out_real = (jnp.dot(Mr.astype(mxu_dtype), id2r_ref[...],
                        preferred_element_type=f32)
                - jnp.dot(Mi.astype(mxu_dtype), id2i_ref[...],
                          preferred_element_type=f32))               # (M, HW)

    # --- min_max(x, 0, 1) per (batch, group) map ------------------------------
    mn = jnp.min(out_real, axis=1, keepdims=True)
    mx = jnp.max(out_real, axis=1, keepdims=True)
    attn = (out_real - mn) * pl.reciprocal(mx - mn + 1e-12, approx=True)

    # out = feature + gamma * (feature * attn) = feature * (1 + gamma * attn)
    out3 = feat3 * (1.0 + gamma_ref[...] * attn[:, None, :])         # (M, K, HW)
    out_ref[...] = out3.reshape(bt, group * K, HW)


# ----------------------------------------------------------------------------
# Host-side constant construction (done once) + jitted wrapper.
# ----------------------------------------------------------------------------
def radial_labels(H, W, d):
    ch, cw = H // 2, W // 2
    R = min(ch, cw)
    hh = np.arange(H)[:, None] - ch
    ww = np.arange(W)[None, :] - cw
    r_floor = np.minimum(np.floor(np.sqrt(hh * hh + ww * ww)), R)
    labels = np.ceil(r_floor / d).astype(np.int64)                   # (H, W)
    n_labels = int(R / d) + 1
    return labels, n_labels


def _dft(n):
    k = np.arange(n)
    return np.exp(-2j * np.pi * np.outer(k, k) / n)


def build_fgs_attn(fc_w, fc_b, gamma, *, C, H, W, group, d,
                   batch_tile=1, mxu_dtype=jnp.float32):
    """Precompute all constants once; return a jitted forward(feature)."""
    K = C // group
    HW = H * W
    bt = int(batch_tile)
    M = bt * group

    labels, n_labels = radial_labels(H, W, d)
    LP = max(128, -(-n_labels // 128) * 128)          # lane-aligned band count
    assert n_labels <= LP

    # one-hot band membership + reciprocal counts (folded into fc weights)
    onehot = np.zeros((HW, LP), np.float32)
    onehot[np.arange(HW), labels.reshape(-1)] = 1.0
    cinv = (1.0 / np.maximum(onehot.sum(axis=0), 1.0)).astype(np.float32)

    # Combined shifted 2-D (i)DFT matrices (shift permutations folded in):
    #   vec(fftshift(fft2(X)))          = vec(X) @ D2
    #   vec(real(ifft2(ifftshift(S))))  = real(vec(S) @ iD2)
    Fh = np.fft.fftshift(_dft(H), axes=(0,))
    Fw = np.fft.fftshift(_dft(W), axes=(0,))
    D2 = np.kron(Fh, Fw).T                                   # (HW, HW)
    Ah = (np.conj(_dft(H)) / H) @ np.fft.ifftshift(np.eye(H), axes=(0,))
    Aw = (np.conj(_dft(W)) / W) @ np.fft.ifftshift(np.eye(W), axes=(0,))
    iD2 = np.kron(Ah, Aw).T                                  # (HW, HW)

    # Row-order permutations between b-major (b*group+g) and g-major (g*bt+b).
    b2g = np.zeros((M, M), np.float32)
    for b in range(bt):
        for g in range(group):
            b2g[g * bt + b, b * group + g] = 1.0
    g2b = np.ascontiguousarray(b2g.T)

    # fc params: pad to LP, transpose, fold 1/count band normalization into the
    # weight rows.  Hoisted here so nothing is re-materialized per call.
    fc_w = np.asarray(fc_w, np.float32)
    fc_b = np.asarray(fc_b, np.float32)
    fcwT = np.zeros((group, LP, LP), np.float32)
    fcwT[:, :n_labels, :n_labels] = np.transpose(fc_w, (0, 2, 1))
    fcwT *= cinv[None, :, None]
    fcb = np.zeros((group, 1, LP), np.float32)
    fcb[:, 0, :n_labels] = fc_b
    gamma_t = np.tile(np.asarray(gamma, np.float32).reshape(group, K, 1),
                      (bt, 1, 1))                            # (M, K, 1)

    consts = (
        jnp.asarray(np.real(D2), dtype=mxu_dtype),
        jnp.asarray(np.imag(D2), dtype=mxu_dtype),
        jnp.asarray(np.real(iD2), dtype=mxu_dtype),
        jnp.asarray(np.imag(iD2), dtype=mxu_dtype),
        jnp.asarray(onehot, dtype=mxu_dtype),
        jnp.asarray(np.ascontiguousarray(onehot.T), dtype=mxu_dtype),
        jnp.asarray(b2g), jnp.asarray(g2b),
        jnp.asarray(fcwT), jnp.asarray(fcb), jnp.asarray(gamma_t),
    )

    kernel = functools.partial(_fgs_kernel, bt=bt, group=group, K=K, HW=HW,
                               mxu_dtype=mxu_dtype)

    def const_spec(shape):
        zeros = (0,) * len(shape)
        return pl.BlockSpec(shape, lambda b: zeros)          # constant -> DMA'd once

    in_specs = [
        pl.BlockSpec((bt, C, HW), lambda b: (b, 0, 0)),      # feature (lane-dense)
        const_spec((HW, HW)), const_spec((HW, HW)),          # D2 real / imag
        const_spec((HW, HW)), const_spec((HW, HW)),          # iD2 real / imag
        const_spec((HW, LP)), const_spec((LP, HW)),          # onehot / onehot^T
        const_spec((M, M)), const_spec((M, M)),              # row permutations
        const_spec((group, LP, LP)), const_spec((group, 1, LP)),   # fc w / b
        const_spec((M, K, 1)),                               # gamma (tiled over bt)
    ]
    out_spec = pl.BlockSpec((bt, C, HW), lambda b: (b, 0, 0))

    @jax.jit
    def forward(feature):
        B = feature.shape[0]
        featf = feature.reshape(B, C, HW).astype(jnp.float32)
        nblk = -(-B // bt)
        Bp = nblk * bt
        if Bp != B:                                          # static zero-pad
            featf = jnp.pad(featf, ((0, Bp - B), (0, 0), (0, 0)))
        out = pl.pallas_call(
            kernel,
            out_shape=jax.ShapeDtypeStruct((Bp, C, HW), jnp.float32),
            grid_spec=pltpu.PrefetchScalarGridSpec(
                num_scalar_prefetch=0,
                grid=(nblk,),
                in_specs=in_specs,
                out_specs=out_spec,
            ),
            compiler_params=pltpu.CompilerParams(
                dimension_semantics=("parallel",),
                vmem_limit_bytes=32 * 1024 * 1024),
        )(featf, *consts)
        return out[:B].reshape(B, C, H, W)

    return forward


# ----------------------------------------------------------------------------
# Pure numpy reference (mirrors the PyTorch forward) for a correctness check.
# ----------------------------------------------------------------------------
def ref_forward(feature, fc_w, fc_b, gamma, *, group, d):
    feature = np.asarray(feature, np.float64)
    B, C, H, W = feature.shape
    K = C // group
    labels, n_labels = radial_labels(H, W, d)
    fc_w = np.asarray(fc_w, np.float64)
    fc_b = np.asarray(fc_b, np.float64)
    feat1 = np.zeros_like(feature)
    for g in range(group):
        fi = feature[:, g * K:(g + 1) * K]
        comp = fi.mean(axis=1) + fi.max(axis=1)
        for b in range(B):
            f = np.fft.fftshift(np.fft.fft2(comp[b]))
            amp = np.abs(f)
            avgs = np.array([amp[labels == l].mean() for l in range(n_labels)])
            z = avgs @ fc_w[g].T + fc_b[g]
            att = np.where(z >= 0, z, LEAKY_SLOPE * z)
            merged = f * att[labels]
            outr = np.real(np.fft.ifft2(np.fft.ifftshift(merged)))
            attn = (outr - outr.min()) / (outr.max() - outr.min())
            feat1[b, g * K:(g + 1) * K] = fi[b] * attn
    gam = np.asarray(gamma, np.float64).reshape(1, C, 1, 1)
    return feature + gam * feat1


if __name__ == "__main__":
    # FGSAttn(dim=8, double_R=16, group=2, d=1, init_values=0.5) on (4, 8, 16, 16)
    B, C, H, W = 4, 8, 16, 16
    group, d, init_values = 2, 1, 0.5
    _, n_labels = radial_labels(H, W, d)   # == int(double_R/2/d)+1 with double_R=16

    key = jax.random.PRNGKey(0)
    k1, k2, k3 = jax.random.split(key, 3)
    feature = jax.random.normal(k1, (B, C, H, W), jnp.float32)
    fc_w = 0.2 * jax.random.normal(k2, (group, n_labels, n_labels), jnp.float32)
    fc_b = 0.1 * jax.random.normal(k3, (group, n_labels), jnp.float32)
    gamma = init_values * jnp.ones((C,), jnp.float32)

    # batch_tile=2 -> grid=(2,): batched M=bt*group rows per step, and two grid
    # steps so both v7x TensorCores stay busy (harmless on v5e/v6e).
    fwd = build_fgs_attn(np.asarray(fc_w), np.asarray(fc_b), np.asarray(gamma),
                         C=C, H=H, W=W, group=group, d=d, batch_tile=2)
    out = jax.block_until_ready(fwd(feature))

    ref = ref_forward(np.asarray(feature), np.asarray(fc_w), np.asarray(fc_b),
                      np.asarray(gamma), group=group, d=d)
    assert out.shape == (B, C, H, W)
    np.testing.assert_allclose(np.asarray(out), ref, rtol=2e-2, atol=2e-2)
    print("KERNEL_OK")
</pallas_src>

<mosaic_0001>
module attributes {stable_mosaic.version = 11 : i64} {
  func.func @_fgs_kernel(%arg0: i32, %arg1: memref<2x8x256xf32, #tpu.memory_space<vmem>>, %arg2: memref<256x256xf32, #tpu.memory_space<vmem>>, %arg3: memref<256x256xf32, #tpu.memory_space<vmem>>, %arg4: memref<256x256xf32, #tpu.memory_space<vmem>>, %arg5: memref<256x256xf32, #tpu.memory_space<vmem>>, %arg6: memref<256x128xf32, #tpu.memory_space<vmem>>, %arg7: memref<128x256xf32, #tpu.memory_space<vmem>>, %arg8: memref<4x4xf32, #tpu.memory_space<vmem>>, %arg9: memref<4x4xf32, #tpu.memory_space<vmem>>, %arg10: memref<2x128x128xf32, #tpu.memory_space<vmem>>, %arg11: memref<2x1x128xf32, #tpu.memory_space<vmem>>, %arg12: memref<4x4x1xf32, #tpu.memory_space<vmem>>, %arg13: memref<2x8x256xf32, #tpu.memory_space<vmem>>) attributes {dimension_semantics = [#tpu.dimension_semantics<parallel>], iteration_bounds = array<i64: 2>, scalar_prefetch = 0 : i64, scratch_operands = 0 : i64, tpu.core_type = #tpu.core_type<tc>, window_params = [{transform_indices = @transform_0, window_bounds = array<i64: 2, 8, 256>}, {pipeline_mode = #tpu.pipeline_mode<synchronous>, transform_indices = @transform_1, window_bounds = array<i64: 256, 256>}, {pipeline_mode = #tpu.pipeline_mode<synchronous>, transform_indices = @transform_2, window_bounds = array<i64: 256, 256>}, {pipeline_mode = #tpu.pipeline_mode<synchronous>, transform_indices = @transform_3, window_bounds = array<i64: 256, 256>}, {pipeline_mode = #tpu.pipeline_mode<synchronous>, transform_indices = @transform_4, window_bounds = array<i64: 256, 256>}, {pipeline_mode = #tpu.pipeline_mode<synchronous>, transform_indices = @transform_5, window_bounds = array<i64: 256, 128>}, {pipeline_mode = #tpu.pipeline_mode<synchronous>, transform_indices = @transform_6, window_bounds = array<i64: 128, 256>}, {pipeline_mode = #tpu.pipeline_mode<synchronous>, transform_indices = @transform_7, window_bounds = array<i64: 4, 4>}, {pipeline_mode = #tpu.pipeline_mode<synchronous>, transform_indices = @transform_8, window_bounds = array<i64: 4, 4>}, {pipeline_mode = #tpu.pipeline_mode<synchronous>, transform_indices = @transform_9, window_bounds = array<i64: 2, 128, 128>}, {pipeline_mode = #tpu.pipeline_mode<synchronous>, transform_indices = @transform_10, window_bounds = array<i64: 2, 1, 128>}, {pipeline_mode = #tpu.pipeline_mode<synchronous>, transform_indices = @transform_11, window_bounds = array<i64: 4, 4, 1>}, {transform_indices = @transform_12, window_bounds = array<i64: 2, 8, 256>}]} {
    %c0 = arith.constant 0 : index
    %c0_0 = arith.constant 0 : index
    %c0_1 = arith.constant 0 : index
    %0 = vector.load %arg1[%c0, %c0_0, %c0_1] : memref<2x8x256xf32, #tpu.memory_space<vmem>>, vector<2x8x256xf32>
    %1 = vector.shape_cast %0 : vector<2x8x256xf32> to vector<4x4x256xf32>
    %cst = arith.constant dense<0.000000e+00> : vector<4x256xf32>
    %2 = vector.multi_reduction <add>, %1, %cst [1] : vector<4x4x256xf32> to vector<4x256xf32>
    %cst_2 = arith.constant 4.000000e+00 : f32
    %3 = vector.broadcast %cst_2 : f32 to vector<4x256xf32>
    %4 = arith.divf %2, %3 : vector<4x256xf32>
    %cst_3 = arith.constant dense<0xFF800000> : vector<4x256xf32>
    %5 = vector.multi_reduction <maximumf>, %1, %cst_3 [1] : vector<4x4x256xf32> to vector<4x256xf32>
    %6 = arith.addf %4, %5 : vector<4x256xf32>
    %c0_4 = arith.constant 0 : index
    %c0_5 = arith.constant 0 : index
    %7 = vector.load %arg2[%c0_4, %c0_5] : memref<256x256xf32, #tpu.memory_space<vmem>>, vector<256x256xf32>
    %cst_6 = arith.constant dense<0.000000e+00> : vector<4x256xf32>
    %8 = tpu.matmul %6, %7, %cst_6 {dimension_numbers = #tpu.dot_dimension_numbers<[1], [0], [0], [1], [0, 0, 1, 1], [], []>} : vector<4x256xf32>, vector<256x256xf32>, vector<4x256xf32> -> vector<4x256xf32>
    %c0_7 = arith.constant 0 : index
    %c0_8 = arith.constant 0 : index
    %9 = vector.load %arg3[%c0_7, %c0_8] : memref<256x256xf32, #tpu.memory_space<vmem>>, vector<256x256xf32>
    %cst_9 = arith.constant dense<0.000000e+00> : vector<4x256xf32>
    %10 = tpu.matmul %6, %9, %cst_9 {dimension_numbers = #tpu.dot_dimension_numbers<[1], [0], [0], [1], [0, 0, 1, 1], [], []>} : vector<4x256xf32>, vector<256x256xf32>, vector<4x256xf32> -> vector<4x256xf32>
    %11 = arith.mulf %8, %8 : vector<4x256xf32>
    %12 = arith.mulf %10, %10 : vector<4x256xf32>
    %13 = arith.addf %11, %12 : vector<4x256xf32>
    %14 = math.sqrt %13 : vector<4x256xf32>
    %c0_10 = arith.constant 0 : index
    %c0_11 = arith.constant 0 : index
    %15 = vector.load %arg6[%c0_10, %c0_11] : memref<256x128xf32, #tpu.memory_space<vmem>>, vector<256x128xf32>
    %cst_12 = arith.constant dense<0.000000e+00> : vector<4x128xf32>
    %16 = tpu.matmul %14, %15, %cst_12 {dimension_numbers = #tpu.dot_dimension_numbers<[1], [0], [0], [1], [0, 0, 1, 1], [], []>} : vector<4x256xf32>, vector<256x128xf32>, vector<4x128xf32> -> vector<4x128xf32>
    %c0_13 = arith.constant 0 : index
    %c0_14 = arith.constant 0 : index
    %17 = vector.load %arg8[%c0_13, %c0_14] : memref<4x4xf32, #tpu.memory_space<vmem>>, vector<4x4xf32>
    %cst_15 = arith.constant dense<0.000000e+00> : vector<4x128xf32>
    %18 = tpu.matmul %17, %16, %cst_15 {dimension_numbers = #tpu.dot_dimension_numbers<[1], [0], [0], [1], [0, 0, 1, 1], [], []>} : vector<4x4xf32>, vector<4x128xf32>, vector<4x128xf32> -> vector<4x128xf32>
    %19 = vector.shape_cast %18 : vector<4x128xf32> to vector<2x2x128xf32>
    %c0_16 = arith.constant 0 : index
    %c0_17 = arith.constant 0 : index
    %c0_18 = arith.constant 0 : index
    %20 = vector.load %arg10[%c0_16, %c0_17, %c0_18] : memref<2x128x128xf32, #tpu.memory_space<vmem>>, vector<2x128x128xf32>
    %cst_19 = arith.constant dense<0.000000e+00> : vector<2x2x128xf32>
    %21 = tpu.matmul %19, %20, %cst_19 {dimension_numbers = #tpu.dot_dimension_numbers<[2], [1], [1], [2], [0, 0, 0, 1, 1, 2], [0], [0]>} : vector<2x2x128xf32>, vector<2x128x128xf32>, vector<2x2x128xf32> -> vector<2x2x128xf32>
    %c0_20 = arith.constant 0 : index
    %c0_21 = arith.constant 0 : index
    %c0_22 = arith.constant 0 : index
    %22 = vector.load %arg11[%c0_20, %c0_21, %c0_22] : memref<2x1x128xf32, #tpu.memory_space<vmem>>, vector<2x1x128xf32>
    %23 = vector.broadcast %22 : vector<2x1x128xf32> to vector<2x2x128xf32>
    %24 = arith.addf %21, %23 : vector<2x2x128xf32>
    %cst_23 = arith.constant 0.000000e+00 : f32
    %25 = vector.broadcast %cst_23 : f32 to vector<2x2x128xf32>
    %26 = arith.cmpf oge, %24, %25 : vector<2x2x128xf32>
    %cst_24 = arith.constant 0.00999999977 : f32
    %27 = vector.broadcast %cst_24 : f32 to vector<2x2x128xf32>
    %28 = arith.mulf %27, %24 : vector<2x2x128xf32>
    %29 = arith.select %26, %24, %28 : vector<2x2x128xi1>, vector<2x2x128xf32>
    %30 = vector.shape_cast %29 : vector<2x2x128xf32> to vector<4x128xf32>
    %c0_25 = arith.constant 0 : index
    %c0_26 = arith.constant 0 : index
    %31 = vector.load %arg9[%c0_25, %c0_26] : memref<4x4xf32, #tpu.memory_space<vmem>>, vector<4x4xf32>
    %cst_27 = arith.constant dense<0.000000e+00> : vector<4x128xf32>
    %32 = tpu.matmul %31, %30, %cst_27 {dimension_numbers = #tpu.dot_dimension_numbers<[1], [0], [0], [1], [0, 0, 1, 1], [], []>} : vector<4x4xf32>, vector<4x128xf32>, vector<4x128xf32> -> vector<4x128xf32>
    %c0_28 = arith.constant 0 : index
    %c0_29 = arith.constant 0 : index
    %33 = vector.load %arg7[%c0_28, %c0_29] : memref<128x256xf32, #tpu.memory_space<vmem>>, vector<128x256xf32>
    %cst_30 = arith.constant dense<0.000000e+00> : vector<4x256xf32>
    %34 = tpu.matmul %32, %33, %cst_30 {dimension_numbers = #tpu.dot_dimension_numbers<[1], [0], [0], [1], [0, 0, 1, 1], [], []>} : vector<4x128xf32>, vector<128x256xf32>, vector<4x256xf32> -> vector<4x256xf32>
    %35 = arith.mulf %34, %8 : vector<4x256xf32>
    %36 = arith.mulf %34, %10 : vector<4x256xf32>
    %c0_31 = arith.constant 0 : index
    %c0_32 = arith.constant 0 : index
    %37 = vector.load %arg4[%c0_31, %c0_32] : memref<256x256xf32, #tpu.memory_space<vmem>>, vector<256x256xf32>
    %cst_33 = arith.constant dense<0.000000e+00> : vector<4x256xf32>
    %38 = tpu.matmul %35, %37, %cst_33 {dimension_numbers = #tpu.dot_dimension_numbers<[1], [0], [0], [1], [0, 0, 1, 1], [], []>} : vector<4x256xf32>, vector<256x256xf32>, vector<4x256xf32> -> vector<4x256xf32>
    %c0_34 = arith.constant 0 : index
    %c0_35 = arith.constant 0 : index
    %39 = vector.load %arg5[%c0_34, %c0_35] : memref<256x256xf32, #tpu.memory_space<vmem>>, vector<256x256xf32>
    %cst_36 = arith.constant dense<0.000000e+00> : vector<4x256xf32>
    %40 = tpu.matmul %36, %39, %cst_36 {dimension_numbers = #tpu.dot_dimension_numbers<[1], [0], [0], [1], [0, 0, 1, 1], [], []>} : vector<4x256xf32>, vector<256x256xf32>, vector<4x256xf32> -> vector<4x256xf32>
    %41 = arith.subf %38, %40 : vector<4x256xf32>
    %cst_37 = arith.constant dense<0x7F800000> : vector<4xf32>
    %42 = vector.multi_reduction <minimumf>, %41, %cst_37 [1] : vector<4x256xf32> to vector<4xf32>
    %43 = vector.shape_cast %42 : vector<4xf32> to vector<4x1xf32>
    %cst_38 = arith.constant dense<0xFF800000> : vector<4xf32>
    %44 = vector.multi_reduction <maximumf>, %41, %cst_38 [1] : vector<4x256xf32> to vector<4xf32>
    %45 = vector.shape_cast %44 : vector<4xf32> to vector<4x1xf32>
    %46 = vector.broadcast %43 : vector<4x1xf32> to vector<4x256xf32>
    %47 = arith.subf %41, %46 : vector<4x256xf32>
    %48 = arith.subf %45, %43 : vector<4x1xf32>
    %cst_39 = arith.constant 9.99999996E-13 : f32
    %49 = vector.broadcast %cst_39 : f32 to vector<4x1xf32>
    %50 = arith.addf %48, %49 : vector<4x1xf32>
    %51 = tpu.reciprocal %50 {approx = true} : vector<4x1xf32> -> vector<4x1xf32>
    %52 = vector.broadcast %51 : vector<4x1xf32> to vector<4x256xf32>
    %53 = arith.mulf %47, %52 : vector<4x256xf32>
    %c0_40 = arith.constant 0 : index
    %c0_41 = arith.constant 0 : index
    %c0_42 = arith.constant 0 : index
    %54 = vector.load %arg12[%c0_40, %c0_41, %c0_42] : memref<4x4x1xf32, #tpu.memory_space<vmem>>, vector<4x4x1xf32>
    %55 = vector.shape_cast %53 : vector<4x256xf32> to vector<4x1x256xf32>
    %56 = vector.broadcast %54 : vector<4x4x1xf32> to vector<4x4x256xf32>
    %57 = vector.broadcast %55 : vector<4x1x256xf32> to vector<4x4x256xf32>
    %58 = arith.mulf %56, %57 : vector<4x4x256xf32>
    %cst_43 = arith.constant 1.000000e+00 : f32
    %59 = vector.broadcast %cst_43 : f32 to vector<4x4x256xf32>
    %60 = arith.addf %59, %58 : vector<4x4x256xf32>
    %61 = arith.mulf %1, %60 : vector<4x4x256xf32>
    %62 = vector.shape_cast %61 : vector<4x4x256xf32> to vector<2x8x256xf32>
    %c0_44 = arith.constant 0 : index
    %c0_45 = arith.constant 0 : index
    %c0_46 = arith.constant 0 : index
    %63 = vector.load %arg13[%c0_44, %c0_45, %c0_46] : memref<2x8x256xf32, #tpu.memory_space<vmem>>, vector<2x8x256xf32>
    tpu.vector_store %arg13[%c0_44, %c0_45, %c0_46], %62 {strides = array<i32>} : memref<2x8x256xf32, #tpu.memory_space<vmem>>, vector<2x8x256xf32>,
    return
  }
  func.func @transform_0(%arg0: i32) -> (i32, i32, i32) {
    %c0_i32 = arith.constant 0 : i32
    %c0_i32_0 = arith.constant 0 : i32
    %c0_i32_1 = arith.constant 0 : i32
    return %arg0, %c0_i32, %c0_i32_0 : i32, i32, i32
  }
  func.func @transform_1(%arg0: i32) -> (i32, i32) {
    %c0_i32 = arith.constant 0 : i32
    %c0_i32_0 = arith.constant 0 : i32
    %c0_i32_1 = arith.constant 0 : i32
    return %c0_i32, %c0_i32_0 : i32, i32
  }
  func.func @transform_2(%arg0: i32) -> (i32, i32) {
    %c0_i32 = arith.constant 0 : i32
    %c0_i32_0 = arith.constant 0 : i32
    %c0_i32_1 = arith.constant 0 : i32
    return %c0_i32, %c0_i32_0 : i32, i32
  }
  func.func @transform_3(%arg0: i32) -> (i32, i32) {
    %c0_i32 = arith.constant 0 : i32
    %c0_i32_0 = arith.constant 0 : i32
    %c0_i32_1 = arith.constant 0 : i32
    return %c0_i32, %c0_i32_0 : i32, i32
  }
  func.func @transform_4(%arg0: i32) -> (i32, i32) {
    %c0_i32 = arith.constant 0 : i32
    %c0_i32_0 = arith.constant 0 : i32
    %c0_i32_1 = arith.constant 0 : i32
    return %c0_i32, %c0_i32_0 : i32, i32
  }
  func.func @transform_5(%arg0: i32) -> (i32, i32) {
    %c0_i32 = arith.constant 0 : i32
    %c0_i32_0 = arith.constant 0 : i32
    %c0_i32_1 = arith.constant 0 : i32
    return %c0_i32, %c0_i32_0 : i32, i32
  }
  func.func @transform_6(%arg0: i32) -> (i32, i32) {
    %c0_i32 = arith.constant 0 : i32
    %c0_i32_0 = arith.constant 0 : i32
    %c0_i32_1 = arith.constant 0 : i32
    return %c0_i32, %c0_i32_0 : i32, i32
  }
  func.func @transform_7(%arg0: i32) -> (i32, i32) {
    %c0_i32 = arith.constant 0 : i32
    %c0_i32_0 = arith.constant 0 : i32
    %c0_i32_1 = arith.constant 0 : i32
    return %c0_i32, %c0_i32_0 : i32, i32
  }
  func.func @transform_8(%arg0: i32) -> (i32, i32) {
    %c0_i32 = arith.constant 0 : i32
    %c0_i32_0 = arith.constant 0 : i32
    %c0_i32_1 = arith.constant 0 : i32
    return %c0_i32, %c0_i32_0 : i32, i32
  }
  func.func @transform_9(%arg0: i32) -> (i32, i32, i32) {
    %c0_i32 = arith.constant 0 : i32
    %c0_i32_0 = arith.constant 0 : i32
    %c0_i32_1 = arith.constant 0 : i32
    %c0_i32_2 = arith.constant 0 : i32
    return %c0_i32, %c0_i32_0, %c0_i32_1 : i32, i32, i32
  }
  func.func @transform_10(%arg0: i32) -> (i32, i32, i32) {
    %c0_i32 = arith.constant 0 : i32
    %c0_i32_0 = arith.constant 0 : i32
    %c0_i32_1 = arith.constant 0 : i32
    %c0_i32_2 = arith.constant 0 : i32
    return %c0_i32, %c0_i32_0, %c0_i32_1 : i32, i32, i32
  }
  func.func @transform_11(%arg0: i32) -> (i32, i32, i32) {
    %c0_i32 = arith.constant 0 : i32
    %c0_i32_0 = arith.constant 0 : i32
    %c0_i32_1 = arith.constant 0 : i32
    %c0_i32_2 = arith.constant 0 : i32
    return %c0_i32, %c0_i32_0, %c0_i32_1 : i32, i32, i32
  }
  func.func @transform_12(%arg0: i32) -> (i32, i32, i32) {
    %c0_i32 = arith.constant 0 : i32
    %c0_i32_0 = arith.constant 0 : i32
    %c0_i32_1 = arith.constant 0 : i32
    return %arg0, %c0_i32, %c0_i32_0 : i32, i32, i32
  }
}

</mosaic_0001>

<bundles_post_ra>
// kernel: forward.1
= control target key start
LH: loop header
LB: loop body
LE: loop exit
PB: predicated region body
PF: predicated region fallthrough
CT: control target
= control target key end

     0   :  { %s3782_s0 = inlined_call_operand.vmem [shape: f32[4,8,256], index: 0, kind: input, shape index: {}]   ;;  %s3783_s1 = inlined_call_operand.hbm [shape: f32[256,256], index: 1, kind: input, shape index: {}]   ;;  %s3784_s2 = inlined_call_operand.hbm [shape: f32[256,256], index: 2, kind: input, shape index: {}]   ;;  %s3785_s3 = inlined_call_operand.hbm [shape: f32[256,256], index: 3, kind: input, shape index: {}]   ;;  %s3786_s4 = inlined_call_operand.vmem [shape: f32[256,256], index: 4, kind: input, shape index: {}]   ;;  %s3787_s5 = inlined_call_operand.hbm [shape: f32[256,128], index: 5, kind: input, shape index: {}]   ;;  %s3788_s6 = inlined_call_operand.hbm [shape: f32[128,256], index: 6, kind: input, shape index: {}]   ;;  %s3789_s7 = inlined_call_operand.vmem [shape: f32[4,4], index: 7, kind: input, shape index: {}, may-alias: {7,8}]   ;;  %s3790_s8 = inlined_call_operand.vmem [shape: f32[4,4], index: 8, kind: input, shape index: {}, may-alias: {7,8}]   ;;  %s3791_s9 = inlined_call_operand.hbm [shape: f32[2,128,128], index: 9, kind: input, shape index: {}]   ;;  %s3792_s10 = inlined_call_operand.vmem [shape: f32[2,1,128], index: 10, kind: input, shape index: {}]   ;;  %s3793_s11 = inlined_call_operand.vmem [shape: f32[4,4,1], index: 11, kind: input, shape index: {}]   ;;  %s3794_s12 = inlined_call_operand.vmem [shape: f32[4,8,256], index: 12, kind: output, shape index: {}]  }
   0x1   :  { %3805 = sst [smem:[#allocation16_spill]] %s3784_s2 }
   0x2   :  { %3806 = sst [smem:[#allocation17_spill]] %s3794_s12 }
   0x3   :  { %17 = vsyncpa [#allocation3], 0 }
   0x4   :  { %18 = vsyncpa [#allocation5], 0 }
   0x5   :  { %19 = vsyncpa [#allocation8], 0 }
   0x6   :  { %20 = vsyncpa [#allocation11], 0  ;;  %s3025_s21 = smov 0  }
   0x7 LB: > { %s3795_s22 = sadd.s32 4294967295, %s2942_s21   ;;  %p2101_p0 = scmp.ge.s32.totalorder %s2942_s21, 1  ;;  %s2942_s21 = sphi %s3025_s21, %s26_s21  }
   0x8   : > { %p314_p1 = scmp.lt.s32.totalorder %s2942_s21, 3  ;;  %p3035_p2 = scmp.eq.s32.totalorder %s3795_s22, 0 }
   0x9   : > { %s2944_s25 = smov [#allocation4]   ;;  %s2945_s27 = smov [#allocation7]  }
   0xa   : > { %s3807_s23 = scalar_select %p3035_p2, 1, 0 }
   0xb   : > { %p3039_p3 = pnand %p2101_p0, %p314_p1  ;;  %s339_s26 = sshll.u32 %s2944_s25, 4  ;;  %s3043_s26 = int_to_ptr.vmem [resolvable:$true] %s339_s26 }
   0xc   : > { %s368_s28 = sshll.u32 %s2945_s27, 4  ;;  %s2946_s30 = smov [#allocation2]   ;;  %s3047_s28 = int_to_ptr.vmem [resolvable:$true] %s368_s28 }
   0xd   : > { %s3808_s24 = scalar_select %p3039_p3, 1, 0 }
   0xe   : > { %p2681_p4 = pneg %p3039_p3  ;;  %s3055_s13 = sshll.u32 %s2946_s30, 4  ;;  %s327_s13 = int_to_ptr.vmem [resolvable:$true] %s3055_s13 }
   0xf   : > { %s3810_s2 = sld [smem:[#allocation16_spill]] }
  0x10   : > { %p3051_p5 = pnand %p3035_p2, %p2681_p4 }
  0x12   : > { %p3065_p7 = pneg %p3051_p5 }
  0x15   : > { %s2752_s16 = scalar_lea.hbm %s3810_s2, 8192 }
  0x16   : > { %p2753_p6 = scmp.ne.s32.totalorder %s3810_s2, %s2752_s16  ;;  %p2759_p10 = scmp.lt.u32.totalorder %s2752_s16, %s3810_s2 }
  0x18   : > { %p2755_p8 = pnand %p3065_p7, %p2753_p6 }
  0x1a   : > { %p2756_p9 = pneg %p2755_p8 }
  0x1c   : > { %p2761_p11 = pnand %p2759_p10, %p2756_p9 }
  0x1e   : > { %2764 = shalt.err (!%p2761_p11)
}
  0x1f   : > { %s2765_s27 = scalar_lea.vmem %s3043_s26, 8192  ;;  %p2773_p1 = scmp.lt.s32.totalorder %s3043_s26, %s3043_s26 }
  0x20   : > { %p2766_p12 = scmp.ne.s32.totalorder %s3043_s26, %s2765_s27  ;;  %p2774_p4 = scmp.lt.s32.totalorder %s2765_s27, %s2765_s27 }
  0x22   : > { %p2768_p13 = pnand %p2766_p12, %p3065_p7  ;;  %p2775_p6 = por %p2774_p4, %p2773_p1 }
  0x24   : > { %p2769_p0 = pneg %p2768_p13 }
  0x26   : > { %p2776_p8 = pnand %p2775_p6, %p2769_p0 }
  0x28   : > { %2779 = shalt.err (!%p2776_p8)
}
  0x29   : > { %s3796_s30 = smov 256   ;;  %s3798_s14 = smov 16  }
  0x2a   : > { %2687 = dma.hbm_to_vmem [thread:$0]  (!%p3051_p5), %s3810_s2, 8192, %s3043_s26, [#allocation5], %s3796_s30, %s3796_s30, %s3798_s14  }
  0x2b   : > { %s2780_s20 = scalar_lea.hbm %s3787_s5, 4096 }
  0x2c   : > { %p2781_p9 = scmp.ne.s32.totalorder %s3787_s5, %s2780_s20  ;;  %p2787_p12 = scmp.lt.u32.totalorder %s2780_s20, %s3787_s5 }
  0x2e   : > { %p2783_p10 = pnand %p2781_p9, %p3065_p7 }
  0x30   : > { %p2784_p11 = pneg %p2783_p10 }
  0x32   : > { %p2789_p13 = pnand %p2787_p12, %p2784_p11 }
  0x34   : > { %2792 = shalt.err (!%p2789_p13)
}
  0x35   : > { %s2793_s26 = scalar_lea.vmem %s3047_s28, 4096  ;;  %p2801_p6 = scmp.lt.s32.totalorder %s3047_s28, %s3047_s28 }
  0x36   : > { %p2794_p0 = scmp.ne.s32.totalorder %s3047_s28, %s2793_s26  ;;  %p2802_p8 = scmp.lt.s32.totalorder %s2793_s26, %s2793_s26 }
  0x38   : > { %p2796_p1 = pnand %p2794_p0, %p3065_p7  ;;  %p2803_p9 = por %p2802_p8, %p2801_p6 }
  0x3a   : > { %p2797_p4 = pneg %p2796_p1 }
  0x3c   : > { %p2804_p10 = pnand %p2803_p9, %p2797_p4 }
  0x3e   : > { %2807 = shalt.err (!%p2804_p10)
}
  0x3f   : > { %s3803_s15 = smov 128   ;;  %s3804_s12 = smov 8  }
  0x40   : > { %2693 = dma.hbm_to_vmem [thread:$0]  (!%p3051_p5), %s3787_s5, 4096, %s3047_s28, [#allocation8], %s3803_s15, %s3803_s15, %s3804_s12  }
  0x41   : > { %s2951_s17 = smov [#allocation6]   ;;  %s2808_s27 = scalar_lea.hbm %s3783_s1, 8192 }
  0x42   : > { %s352_s18 = sshll.u32 %s2951_s17, 4  ;;  %p2809_p11 = scmp.ne.s32.totalorder %s3783_s1, %s2808_s27  ;;  %s353_s18 = int_to_ptr.vmem [resolvable:$true] %s352_s18 }
  0x43   : > { %p2815_p0 = scmp.lt.u32.totalorder %s2808_s27, %s3783_s1 }
  0x44   : > { %p2811_p12 = pnand %p2809_p11, %p3065_p7 }
  0x46   : > { %p2812_p13 = pneg %p2811_p12 }
  0x48   : > { %p2817_p1 = pnand %p2815_p0, %p2812_p13 }
  0x4a   : > { %2820 = shalt.err (!%p2817_p1)
}
  0x4b   : > { %s2821_s28 = scalar_lea.vmem %s327_s13, 8192  ;;  %p2829_p9 = scmp.lt.s32.totalorder %s327_s13, %s327_s13 }
  0x4c   : > { %p2822_p4 = scmp.ne.s32.totalorder %s327_s13, %s2821_s28  ;;  %p2830_p10 = scmp.lt.s32.totalorder %s2821_s28, %s2821_s28 }
  0x4e   : > { %p2824_p6 = pnand %p2822_p4, %p3065_p7  ;;  %p2831_p2 = por %p2830_p10, %p2829_p9 }
  0x50   : > { %p2825_p8 = pneg %p2824_p6 }
  0x52   : > { %p2832_p3 = pnand %p2831_p2, %p2825_p8 }
  0x54   : > { %2835 = shalt.err (!%p2832_p3)
}
  0x55   : > { %s3812_s30 = smov 16   ;;  %s3813_s22 = smov 256  }
  0x56   : > { %2684 = dma.hbm_to_vmem [thread:$0]  (!%p3051_p5), %s3783_s1, 8192, %s327_s13, [#allocation3], %s3813_s22, %s3813_s22, %s3812_s30  }
  0x57   : > { %s2836_s20 = scalar_lea.hbm %s3785_s3, 8192 }
  0x58   : > { %p2837_p2 = scmp.ne.s32.totalorder %s3785_s3, %s2836_s20  ;;  %p2843_p12 = scmp.lt.u32.totalorder %s2836_s20, %s3785_s3 }
  0x5a   : > { %p2839_p3 = pnand %p2837_p2, %p3065_p7 }
  0x5c   : > { %p2840_p11 = pneg %p2839_p3 }
  0x5e   : > { %p2845_p13 = pnand %p2843_p12, %p2840_p11 }
  0x60   : > { %2848 = shalt.err (!%p2845_p13)
}
  0x61   : > { %s2849_s2 = scalar_lea.vmem %s353_s18, 8192  ;;  %p2857_p6 = scmp.lt.s32.totalorder %s353_s18, %s353_s18 }
  0x62   : > { %p2850_p0 = scmp.ne.s32.totalorder %s353_s18, %s2849_s2  ;;  %p2858_p8 = scmp.lt.s32.totalorder %s2849_s2, %s2849_s2 }
  0x64   : > { %p2852_p1 = pnand %p2850_p0, %p3065_p7  ;;  %p2859_p9 = por %p2858_p8, %p2857_p6 }
  0x66   : > { %p2853_p4 = pneg %p2852_p1 }
  0x68   : > { %p2860_p10 = pnand %p2859_p9, %p2853_p4 }
  0x6a   : > { %2863 = shalt.err (!%p2860_p10)
}
  0x6b   : > { %2690 = dma.hbm_to_vmem [thread:$0]  (!%p3051_p5), %s3785_s3, 8192, %s353_s18, [#allocation5], %s3813_s22, %s3813_s22, %s3812_s30  }
  0x6c   : > { %s2952_s16 = smov [#allocation9]   ;;  %s2953_s20 = smov [#allocation10]  }
  0x6d   : > { %s381_s17 = sshll.u32 %s2952_s16, 4  ;;  %s400_s25 = sshll.u32 %s2953_s20, 4  ;;  %s382_s17 = int_to_ptr.vmem [resolvable:$true] %s381_s17  ;;  %s401_s25 = int_to_ptr.vmem [resolvable:$true] %s400_s25 }
  0x6e   : > { %s2864_s28 = scalar_lea.hbm %s3788_s6, 4096 }
  0x6f   : > { %p2865_p2 = scmp.ne.s32.totalorder %s3788_s6, %s2864_s28  ;;  %p2871_p12 = scmp.lt.u32.totalorder %s2864_s28, %s3788_s6 }
  0x71   : > { %p2867_p3 = pnand %p2865_p2, %p3065_p7 }
  0x73   : > { %p2868_p11 = pneg %p2867_p3 }
  0x75   : > { %p2873_p13 = pnand %p2871_p12, %p2868_p11 }
  0x77   : > { %2876 = shalt.err (!%p2873_p13)
}
  0x78   : > { %s2877_s18 = scalar_lea.vmem %s382_s17, 4096  ;;  %p2885_p6 = scmp.lt.s32.totalorder %s382_s17, %s382_s17 }
  0x79   : > { %p2878_p0 = scmp.ne.s32.totalorder %s382_s17, %s2877_s18  ;;  %p2886_p8 = scmp.lt.s32.totalorder %s2877_s18, %s2877_s18 }
  0x7b   : > { %p2880_p1 = pnand %p2878_p0, %p3065_p7  ;;  %p2887_p9 = por %p2886_p8, %p2885_p6 }
  0x7d   : > { %p2881_p4 = pneg %p2880_p1 }
  0x7f   : > { %p2888_p10 = pnand %p2887_p9, %p2881_p4 }
  0x81   : > { %2891 = shalt.err (!%p2888_p10)
}
  0x82   : > { %2696 = dma.hbm_to_vmem [thread:$0]  (!%p3051_p5), %s3788_s6, 4096, %s382_s17, [#allocation8], %s3813_s22, %s3813_s22, %s3812_s30  }
  0x83   : > { %s2892_s20 = scalar_lea.hbm %s3791_s9, 4096 }
  0x84   : > { %p2893_p2 = scmp.ne.s32.totalorder %s3791_s9, %s2892_s20  ;;  %p2899_p12 = scmp.lt.u32.totalorder %s2892_s20, %s3791_s9 }
  0x86   : > { %p2895_p3 = pnand %p2893_p2, %p3065_p7 }
  0x88   : > { %p2896_p11 = pneg %p2895_p3 }
  0x8a   : > { %p2901_p13 = pnand %p2899_p12, %p2896_p11 }
  0x8c   : > { %2904 = shalt.err (!%p2901_p13)
}
  0x8d   : > { %s2905_s13 = scalar_lea.vmem %s401_s25, 4096  ;;  %p2913_p6 = scmp.lt.s32.totalorder %s401_s25, %s401_s25 }
  0x8e   : > { %p2906_p0 = scmp.ne.s32.totalorder %s401_s25, %s2905_s13  ;;  %p2914_p8 = scmp.lt.s32.totalorder %s2905_s13, %s2905_s13 }
  0x90   : > { %p2908_p1 = pnand %p2906_p0, %p3065_p7  ;;  %p2915_p9 = por %p2914_p8, %p2913_p6 }
  0x92   : > { %p2909_p4 = pneg %p2908_p1 }
  0x94   : > { %p2916_p10 = pnand %p2915_p9, %p2909_p4 }
  0x96   : > { %2919 = shalt.err (!%p2916_p10)
}
  0x97   : > { %s3814_s30 = smov 8   ;;  %s3815_s22 = smov 128  }
  0x98   : > { %2699 = dma.hbm_to_vmem [thread:$0]  (!%p3051_p5), %s3791_s9, 4096, %s401_s25, [#allocation11], %s3815_s22, %s3815_s22, %s3814_s30  }
  0x99   : > { %p3816_p2 = scmp.ne.s32.totalorder %s3808_s24, 0 }
  0x9a   : > { %p3817_p7 = scmp.ne.s32.totalorder (!%p3816_p2), %s3807_s23, 0 }
  0x9b   : > { %432 = sbr.rel (%p3816_p2) target bundleno = 1974 (0x7b6), region = 68 }
  0xa2   : > { %2925 = dma.done.wait (%p3817_p7), [#allocation3], 8192  }
  0xa3   : > { %2927 = vsyncadd (%p3817_p7), [#allocation3], 4294959104 }
  0xa4   : > { %2929 = dma.done.wait (%p3817_p7), [#allocation5], 16384  }
  0xa5   : > { %2931 = vsyncadd (%p3817_p7), [#allocation5], 4294950912 }
  0xa6   : > { %2933 = dma.done.wait (%p3817_p7), [#allocation8], 8192  }
  0xa7   : > { %2935 = vsyncadd (%p3817_p7), [#allocation8], 4294959104 }
  0xa8   : > { %2937 = dma.done.wait (%p3817_p7), [#allocation11], 4096  }
  0xa9   : > { %2939 = vsyncadd (%p3817_p7), [#allocation11], 4294963200  ;;  %v665_v0 = vld [vmem:[#allocation2 + $0x8] sm:$0xff]  ;;  %v667_v1 = vld [vmem:[#allocation2 + $0x18] sm:$0xff]  ;;  %s3818_s23 = sadd.s32 4294967295, %s2942_s21   ;;  %vm534_vm0 = vcmask 1043456  }
  0xaa   : > { %v819_v2 = vld [vmem:[#allocation4 + $0x8] sm:$0xff]  ;;  %v2289_v3 = vpack.c.bf16 %v667_v1, %v665_v0  ;;  %v821_v4 = vld [vmem:[#allocation4 + $0x18] sm:$0xff]  ;;  %v664_v5 = vld [vmem:[#allocation2] sm:$0xff]  ;;  %s3220_s24 = sshll.u32 %s3818_s23, 1  ;;  %vm736_vm1 = vcmask 1041409   ;;  %vm738_vm2 = vcmask 1042434  }
  0xab   : > { %v666_v6 = vld [vmem:[#allocation2 + $0x10] sm:$0xff]  ;;  %v2353_v7 = vpack.c.bf16 %v821_v4, %v819_v2  ;;  %v818_v9 = vld [vmem:[#allocation4] sm:$0xff]  ;;  %v669_v11 = vld [vmem:[#allocation2 + $0x28] sm:$0xff]  ;;  %p497_p5 = scmp.lt.s32.totalorder %s3220_s24, 3  ;;  %vm740_vm3 = vcmask 1043459   ;;  %vm2955_vm8 = vmmov 0  }
  0xac   : > { %v2291_v8 = vpack.c.bf16 %v666_v6, %v664_v5  ;;  %v820_v10 = vld [vmem:[#allocation4 + $0x10] sm:$0xff]  ;;  %2290 = vmatprep.subr.bf16.mxu0 %v2289_v3  ;;  %v671_v13 = vld [vmem:[#allocation2 + $0x38] sm:$0xff]  ;;  %v823_v14 = vld [vmem:[#allocation4 + $0x28] sm:$0xff]  ;;  %vm1076_vm9 = vcmask 31744   ;;  %s3832_s22 = sld [smem:[#allocation17_spill]] }
  0xad   : > { %v2355_v12 = vpack.c.bf16 %v820_v10, %v818_v9  ;;  %v825_v15 = vld [vmem:[#allocation4 + $0x38] sm:$0xff]  ;;  %2354 = vmatprep.subr.bf16.mxu1 %v2353_v7  ;;  %v2293_v16 = vpack.c.bf16 %v671_v13, %v669_v11  ;;  %v668_v18 = vld [vmem:[#allocation2 + $0x20] sm:$0xff]  ;;  %v670_v19 = vld [vmem:[#allocation2 + $0x30] sm:$0xff]  ;;  %s3834_s24 = smov (!%p497_p5, %s3220_s24), 3 }
  0xae   : > { %2292 = vmatpush1.bf16.msra.mxu0 %v2291_v8  ;;  %v2357_v17 = vpack.c.bf16 %v825_v15, %v823_v14  ;;  %v822_v20 = vld [vmem:[#allocation4 + $0x20] sm:$0xff]  ;;  %v2295_v21 = vpack.c.bf16 %v670_v19, %v668_v18  ;;  %v824_v22 = vld [vmem:[#allocation4 + $0x30] sm:$0xff]  ;;  %v673_v23 = vld [vmem:[#allocation2 + $0x48] sm:$0xff]  ;;  %s2134_s29 = sshll.u32 %s3834_s24, 4 }
  0xaf   : > { %2356 = vmatpush1.bf16.msra.mxu1 %v2355_v12  ;;  %v675_v24 = vld [vmem:[#allocation2 + $0x58] sm:$0xff]  ;;  %2294 = vmatprep.subr.bf16.mxu0 %v2293_v16  ;;  %v2359_v25 = vpack.c.bf16 %v824_v22, %v822_v20  ;;  %v827_v27 = vld [vmem:[#allocation4 + $0x48] sm:$0xff]  ;;  %v672_v29 = vld [vmem:[#allocation2 + $0x40] sm:$0xff]  ;;  %s3348_s15 = scalar_lea.vmem %s3782_s0, %s2134_s29 }
  0xb0   : > { %2358 = vmatprep.subr.bf16.mxu1 %v2357_v17  ;;  %v2297_v26 = vpack.c.bf16 %v675_v24, %v673_v23  ;;  %v829_v28 = vld [vmem:[#allocation4 + $0x58] sm:$0xff]  ;;  %v674_v31 = vld [vmem:[#allocation2 + $0x50] sm:$0xff]  ;;  %v826_v32 = vld [vmem:[#allocation4 + $0x40] sm:$0xff] }
  0xb1   : > { %v2361_v30 = vpack.c.bf16 %v829_v28, %v827_v27  ;;  %v828_v33 = vld [vmem:[#allocation4 + $0x50] sm:$0xff]  ;;  %v2299_v34 = vpack.c.bf16 %v674_v31, %v672_v29  ;;  %v677_v35 = vld [vmem:[#allocation2 + $0x68] sm:$0xff]  ;;  %v679_v36 = vld [vmem:[#allocation2 + $0x78] sm:$0xff] }
  0xb2   : > { %2296 = vmatpush1.bf16.msra.mxu0 %v2295_v21  ;;  %v831_v37 = vld [vmem:[#allocation4 + $0x68] sm:$0xff]  ;;  %v2363_v38 = vpack.c.bf16 %v828_v33, %v826_v32  ;;  %v2301_v39 = vpack.c.bf16 %v679_v36, %v677_v35  ;;  %v833_v40 = vld [vmem:[#allocation4 + $0x78] sm:$0xff]  ;;  %v676_v41 = vld [vmem:[#allocation2 + $0x60] sm:$0xff]  ;;  %s508_s17 = scalar_lea.vmem %s3832_s22, %s2134_s29 }
  0xb3   : > { %2360 = vmatpush1.bf16.msra.mxu1 %v2359_v25  ;;  %2298 = vmatprep.subr.bf16.mxu0 %v2297_v26  ;;  %v678_v42 = vld [vmem:[#allocation2 + $0x70] sm:$0xff]  ;;  %v2365_v43 = vpack.c.bf16 %v833_v40, %v831_v37  ;;  %v830_v44 = vld [vmem:[#allocation4 + $0x60] sm:$0xff]  ;;  %v681_v46 = vld [vmem:[#allocation2 + $0x88] sm:$0xff] }
  0xb4   : > { %2362 = vmatprep.subr.bf16.mxu1 %v2361_v30  ;;  %v832_v45 = vld [vmem:[#allocation4 + $0x70] sm:$0xff]  ;;  %v683_v47 = vld [vmem:[#allocation2 + $0x98] sm:$0xff]  ;;  %v835_v48 = vld [vmem:[#allocation4 + $0x88] sm:$0xff]  ;;  %v2303_v50 = vpack.c.bf16 %v678_v42, %v676_v41 }
  0xb5   : > { %v837_v49 = vld [vmem:[#allocation4 + $0x98] sm:$0xff]  ;;  %v2367_v51 = vpack.c.bf16 %v832_v45, %v830_v44  ;;  %v2305_v52 = vpack.c.bf16 %v683_v47, %v681_v46  ;;  %v680_v53 = vld [vmem:[#allocation2 + $0x80] sm:$0xff]  ;;  %v682_v54 = vld [vmem:[#allocation2 + $0x90] sm:$0xff] }
  0xb6   : > { %2300 = vmatpush1.bf16.msra.mxu0 %v2299_v34  ;;  %v834_v55 = vld [vmem:[#allocation4 + $0x80] sm:$0xff]  ;;  %v2369_v56 = vpack.c.bf16 %v837_v49, %v835_v48  ;;  %v836_v57 = vld [vmem:[#allocation4 + $0x90] sm:$0xff]  ;;  %v685_v58 = vld [vmem:[#allocation2 + $0xa8] sm:$0xff]  ;;  %v2307_v62 = vpack.c.bf16 %v682_v54, %v680_v53 }
  0xb7   : > { %2364 = vmatpush1.bf16.msra.mxu1 %v2363_v38  ;;  %2302 = vmatprep.subr.bf16.mxu0 %v2301_v39  ;;  %v687_v59 = vld [vmem:[#allocation2 + $0xb8] sm:$0xff]  ;;  %v839_v60 = vld [vmem:[#allocation4 + $0xa8] sm:$0xff]  ;;  %v2371_v63 = vpack.c.bf16 %v836_v57, %v834_v55  ;;  %v684_v1 = vld [vmem:[#allocation2 + $0xa0] sm:$0xff] }
  0xb8   : > { %2366 = vmatprep.subr.bf16.mxu1 %v2365_v43  ;;  %v841_v61 = vld [vmem:[#allocation4 + $0xb8] sm:$0xff]  ;;  %v2309_v0 = vpack.c.bf16 %v687_v59, %v685_v58  ;;  %v686_v2 = vld [vmem:[#allocation2 + $0xb0] sm:$0xff]  ;;  %v838_v3 = vld [vmem:[#allocation4 + $0xa0] sm:$0xff] }
  0xb9   : > { %v2373_v4 = vpack.c.bf16 %v841_v61, %v839_v60  ;;  %v840_v5 = vld [vmem:[#allocation4 + $0xb0] sm:$0xff]  ;;  %v689_v6 = vld [vmem:[#allocation2 + $0xc8] sm:$0xff]  ;;  %v691_v7 = vld [vmem:[#allocation2 + $0xd8] sm:$0xff]  ;;  %v2311_v10 = vpack.c.bf16 %v686_v2, %v684_v1 }
  0xba   : > { %2304 = vmatpush1.bf16.msra.mxu0 %v2303_v50  ;;  %v843_v8 = vld [vmem:[#allocation4 + $0xc8] sm:$0xff]  ;;  %v845_v9 = vld [vmem:[#allocation4 + $0xd8] sm:$0xff]  ;;  %v2375_v11 = vpack.c.bf16 %v840_v5, %v838_v3  ;;  %v2313_v12 = vpack.c.bf16 %v691_v7, %v689_v6  ;;  %v688_v13 = vld [vmem:[#allocation2 + $0xc0] sm:$0xff] }
  0xbb   : > { %2368 = vmatpush1.bf16.msra.mxu1 %v2367_v51  ;;  %2306 = vmatprep.subr.bf16.mxu0 %v2305_v52  ;;  %v690_v14 = vld [vmem:[#allocation2 + $0xd0] sm:$0xff]  ;;  %v842_v15 = vld [vmem:[#allocation4 + $0xc0] sm:$0xff]  ;;  %v2377_v16 = vpack.c.bf16 %v845_v9, %v843_v8  ;;  %v693_v18 = vld [vmem:[#allocation2 + $0xe8] sm:$0xff] }
  0xbc   : > { %2370 = vmatprep.subr.bf16.mxu1 %v2369_v56  ;;  %v844_v17 = vld [vmem:[#allocation4 + $0xd0] sm:$0xff]  ;;  %v695_v19 = vld [vmem:[#allocation2 + $0xf8] sm:$0xff]  ;;  %v847_v20 = vld [vmem:[#allocation4 + $0xe8] sm:$0xff]  ;;  %v2315_v22 = vpack.c.bf16 %v690_v14, %v688_v13 }
  0xbd   : > { %v849_v21 = vld [vmem:[#allocation4 + $0xf8] sm:$0xff]  ;;  %v2379_v23 = vpack.c.bf16 %v844_v17, %v842_v15  ;;  %v2317_v24 = vpack.c.bf16 %v695_v19, %v693_v18  ;;  %v692_v25 = vld [vmem:[#allocation2 + $0xe0] sm:$0xff]  ;;  %v694_v26 = vld [vmem:[#allocation2 + $0xf0] sm:$0xff] }
  0xbe   : > { %2308 = vmatpush1.bf16.msra.mxu0 %v2307_v62  ;;  %v846_v27 = vld [vmem:[#allocation4 + $0xe0] sm:$0xff]  ;;  %v2381_v28 = vpack.c.bf16 %v849_v21, %v847_v20  ;;  %v848_v29 = vld [vmem:[#allocation4 + $0xf0] sm:$0xff]  ;;  %v697_v30 = vld [vmem:[#allocation2 + $0x108] sm:$0xff]  ;;  %v2319_v34 = vpack.c.bf16 %v694_v26, %v692_v25 }
  0xbf   : > { %2372 = vmatpush1.bf16.msra.mxu1 %v2371_v63  ;;  %2310 = vmatprep.subr.bf16.mxu0 %v2309_v0  ;;  %v699_v31 = vld [vmem:[#allocation2 + $0x118] sm:$0xff]  ;;  %v851_v32 = vld [vmem:[#allocation4 + $0x108] sm:$0xff]  ;;  %v696_v35 = vld [vmem:[#allocation2 + $0x100] sm:$0xff]  ;;  %v2383_v37 = vpack.c.bf16 %v848_v29, %v846_v27 }
  0xc0   : > { %2374 = vmatprep.subr.bf16.mxu1 %v2373_v4  ;;  %v853_v33 = vld [vmem:[#allocation4 + $0x118] sm:$0xff]  ;;  %v698_v36 = vld [vmem:[#allocation2 + $0x110] sm:$0xff]  ;;  %v2321_v38 = vpack.c.bf16 %v699_v31, %v697_v30  ;;  %v850_v39 = vld [vmem:[#allocation4 + $0x100] sm:$0xff] }
  0xc1   : > { %v852_v40 = vld [vmem:[#allocation4 + $0x110] sm:$0xff]  ;;  %v701_v41 = vld [vmem:[#allocation2 + $0x128] sm:$0xff]  ;;  %v2385_v42 = vpack.c.bf16 %v853_v33, %v851_v32  ;;  %v703_v43 = vld [vmem:[#allocation2 + $0x138] sm:$0xff]  ;;  %v2323_v50 = vpack.c.bf16 %v698_v36, %v696_v35 }
  0xc2   : > { %2312 = vmatpush1.bf16.msra.mxu0 %v2311_v10  ;;  %v855_v44 = vld [vmem:[#allocation4 + $0x128] sm:$0xff]  ;;  %v857_v45 = vld [vmem:[#allocation4 + $0x138] sm:$0xff]  ;;  %v3223_v46 = vld [vmem:[#allocation2 + $0x120] sm:$0xff]  ;;  %v2387_v57 = vpack.c.bf16 %v852_v40, %v850_v39  ;;  %v2325_v58 = vpack.c.bf16 %v703_v43, %v701_v41 }
  0xc3   : > { %2376 = vmatpush1.bf16.msra.mxu1 %v2375_v11  ;;  %2314 = vmatprep.subr.bf16.mxu0 %v2313_v12  ;;  %v3225_v47 = vld [vmem:[#allocation2 + $0x130] sm:$0xff]  ;;  %v3227_v48 = vld [vmem:[#allocation4 + $0x120] sm:$0xff]  ;;  %v3231_v51 = vld [vmem:[#allocation2 + $0x148] sm:$0xff]  ;;  %v2389_v3 = vpack.c.bf16 %v857_v45, %v855_v44 }
  0xc4   : > { %2378 = vmatprep.subr.bf16.mxu1 %v2377_v16  ;;  %v3229_v49 = vld [vmem:[#allocation4 + $0x130] sm:$0xff]  ;;  %v3233_v52 = vld [vmem:[#allocation2 + $0x158] sm:$0xff]  ;;  %v3235_v53 = vld [vmem:[#allocation4 + $0x148] sm:$0xff]  ;;  %v2327_v18 = vpack.c.bf16 %v3225_v47, %v3223_v46 }
  0xc5   : > { %v3237_v54 = vld [vmem:[#allocation4 + $0x158] sm:$0xff]  ;;  %v3239_v55 = vld [vmem:[#allocation2 + $0x140] sm:$0xff]  ;;  %v3241_v56 = vld [vmem:[#allocation2 + $0x150] sm:$0xff]  ;;  %v2391_v19 = vpack.c.bf16 %v3229_v49, %v3227_v48 }
  0xc6   : > { %2316 = vmatpush1.bf16.msra.mxu0 %v2315_v22  ;;  %v3248_v59 = vld [vmem:[#allocation4 + $0x140] sm:$0xff]  ;;  %v3250_v60 = vld [vmem:[#allocation4 + $0x150] sm:$0xff]  ;;  %v3252_v61 = vld [vmem:[#allocation2 + $0x168] sm:$0xff]  ;;  %v2331_v25 = vpack.c.bf16 %v3241_v56, %v3239_v55 }
  0xc7   : > { %2380 = vmatpush1.bf16.msra.mxu1 %v2379_v23  ;;  %2318 = vmatprep.subr.bf16.mxu0 %v2317_v24  ;;  %v3254_v62 = vld [vmem:[#allocation2 + $0x178] sm:$0xff]  ;;  %v3256_v63 = vld [vmem:[#allocation4 + $0x168] sm:$0xff]  ;;  %v3260_v1 = vld [vmem:[#allocation2 + $0x160] sm:$0xff]  ;;  %v2329_v23 = vpack.c.bf16 %v3233_v52, %v3231_v51  ;;  %v2393_v24 = vpack.c.bf16 %v3237_v54, %v3235_v53  ;;  %v2395_v29 = vpack.c.bf16 %v3250_v60, %v3248_v59 }
  0xc8   : > { %2382 = vmatprep.subr.bf16.mxu1 %v2381_v28  ;;  %v3258_v0 = vld [vmem:[#allocation4 + $0x178] sm:$0xff]  ;;  %v3262_v2 = vld [vmem:[#allocation2 + $0x170] sm:$0xff]  ;;  %v3264_v4 = vld [vmem:[#allocation4 + $0x160] sm:$0xff]  ;;  %v2333_v30 = vpack.c.bf16 %v3254_v62, %v3252_v61 }
  0xc9   : > { %v3266_v5 = vld [vmem:[#allocation4 + $0x170] sm:$0xff]  ;;  %v3268_v6 = vld [vmem:[#allocation2 + $0x188] sm:$0xff]  ;;  %v3270_v7 = vld [vmem:[#allocation2 + $0x198] sm:$0xff]  ;;  %v2397_v31 = vpack.c.bf16 %v3258_v0, %v3256_v63  ;;  %v2335_v32 = vpack.c.bf16 %v3262_v2, %v3260_v1 }
  0xca   : > { %2320 = vmatpush1.bf16.msra.mxu0 %v2319_v34  ;;  %v3272_v8 = vld [vmem:[#allocation4 + $0x188] sm:$0xff]  ;;  %v3274_v9 = vld [vmem:[#allocation4 + $0x198] sm:$0xff]  ;;  %v3276_v10 = vld [vmem:[#allocation2 + $0x180] sm:$0xff]  ;;  %v2399_v36 = vpack.c.bf16 %v3266_v5, %v3264_v4 }
  0xcb   : > { %2384 = vmatpush1.bf16.msra.mxu1 %v2383_v37  ;;  %2322 = vmatprep.subr.bf16.mxu0 %v2321_v38  ;;  %v3278_v11 = vld [vmem:[#allocation2 + $0x190] sm:$0xff]  ;;  %v3280_v12 = vld [vmem:[#allocation4 + $0x180] sm:$0xff]  ;;  %v3284_v14 = vld [vmem:[#allocation2 + $0x1a8] sm:$0xff]  ;;  %v2337_v37 = vpack.c.bf16 %v3270_v7, %v3268_v6  ;;  %v2401_v38 = vpack.c.bf16 %v3274_v9, %v3272_v8 }
  0xcc   : > { %2386 = vmatprep.subr.bf16.mxu1 %v2385_v42  ;;  %v3282_v13 = vld [vmem:[#allocation4 + $0x190] sm:$0xff]  ;;  %v3286_v15 = vld [vmem:[#allocation2 + $0x1b8] sm:$0xff]  ;;  %v3288_v16 = vld [vmem:[#allocation4 + $0x1a8] sm:$0xff]  ;;  %v2339_v39 = vpack.c.bf16 %v3278_v11, %v3276_v10 }
  0xcd   : > { %v3290_v17 = vld [vmem:[#allocation4 + $0x1b8] sm:$0xff]  ;;  %v3296_v20 = vld [vmem:[#allocation2 + $0x1a0] sm:$0xff]  ;;  %v3298_v21 = vld [vmem:[#allocation2 + $0x1b0] sm:$0xff]  ;;  %v3819_v8 = vpack.c.bf16 %v3282_v13, %v3280_v12  ;;  %v3820_v9 = vpack.c.bf16 %v3286_v15, %v3284_v14 }
  0xce   : > { %2324 = vmatpush1.bf16.msra.mxu0 %v2323_v50  ;;  %v3300_v22 = vld [vmem:[#allocation4 + $0x1a0] sm:$0xff]  ;;  %v3309_v26 = vld [vmem:[#allocation4 + $0x1b0] sm:$0xff]  ;;  %v3311_v27 = vld [vmem:[#allocation2 + $0x1c8] sm:$0xff]  ;;  %v3821_v10 = vpack.c.bf16 %v3290_v17, %v3288_v16  ;;  %v3822_v14 = vpack.c.bf16 %v3298_v21, %v3296_v20 }
  0xcf   : > { %2388 = vmatpush1.bf16.msra.mxu1 %v2387_v57  ;;  %2326 = vmatprep.subr.bf16.mxu0 %v2325_v58  ;;  %v3313_v28 = vld [vmem:[#allocation2 + $0x1d8] sm:$0xff]  ;;  %v3323_v33 = vld [vmem:[#allocation4 + $0x1c8] sm:$0xff]  ;;  %v3327_v35 = vld [vmem:[#allocation2 + $0x1c0] sm:$0xff]  ;;  %v3823_v16 = vpack.c.bf16 %v3309_v26, %v3300_v22 }
  0xd0   : > { %2390 = vmatprep.subr.bf16.mxu1 %v2389_v3  ;;  %v3325_v34 = vld [vmem:[#allocation4 + $0x1d8] sm:$0xff]  ;;  %v3337_v40 = vld [vmem:[#allocation2 + $0x1d0] sm:$0xff]  ;;  %v3339_v41 = vld [vmem:[#allocation4 + $0x1c0] sm:$0xff]  ;;  %v3824_v17 = vpack.c.bf16 %v3313_v28, %v3311_v27 }
  0xd1   : > { %v3341_v42 = vld [vmem:[#allocation4 + $0x1d0] sm:$0xff]  ;;  %v3358_v47 = vld [vmem:[#allocation2 + $0x1e8] sm:$0xff]  ;;  %v3360_v48 = vld [vmem:[#allocation2 + $0x1f8] sm:$0xff]  ;;  %v3825_v20 = vpack.c.bf16 %v3325_v34, %v3323_v33  ;;  %v3826_v27 = vpack.c.bf16 %v3337_v40, %v3327_v35 }
  0xd2   : > { %2328 = vmatpush1.bf16.msra.mxu0 %v2327_v18  ;;  %v3362_v49 = vld [vmem:[#allocation4 + $0x1e8] sm:$0xff]  ;;  %v3370_v53 = vld [vmem:[#allocation4 + $0x1f8] sm:$0xff]  ;;  %v3372_v54 = vld [vmem:[#allocation2 + $0x1e0] sm:$0xff]  ;;  %v3827_v34 = vpack.c.bf16 %v3341_v42, %v3339_v41 }
  0xd3   : > { %2392 = vmatpush1.bf16.msra.mxu1 %v2391_v19  ;;  %2330 = vmatprep.subr.bf16.mxu0 %v2329_v23  ;;  %v3374_v55 = vld [vmem:[#allocation2 + $0x1f0] sm:$0xff]  ;;  %v3384_v60 = vld [vmem:[#allocation4 + $0x1e0] sm:$0xff]  ;;  %v511_v62 = vld [vmem:[%s3348_s15 + $0x8] sm:$0xff] }
  0xd4   : > { %2394 = vmatprep.subr.bf16.mxu1 %v2393_v24  ;;  %v3386_v61 = vld [vmem:[#allocation4 + $0x1f0] sm:$0xff]  ;;  %v3394_v1 = vld [vmem:[%s3348_s15 + $0x18] sm:$0xff]  ;;  %v2122_v2 = vcombine.low %v511_v62, %v511_v62  ;;  %v2123_v3 = vcombine.high %v511_v62, %v511_v62  ;;  %v510_v18 = vld [vmem:[%s3348_s15] sm:$0xff] }
  0xd5   : > { %v2124_v19 = vcombine.low %v3394_v1, %v3394_v1  ;;  %v2125_v23 = vcombine.high %v3394_v1, %v3394_v1  ;;  %v3401_v24 = vcombine.low %v510_v18, %v511_v62  ;;  %v3403_v59 = vcombine.high %v510_v18, %v511_v62 }
  0xd6   : > { %2332 = vmatpush1.bf16.msra.mxu0 %v2331_v25  ;;  %v542_v0 = vsel %vm534_vm0, %v2122_v2, 0.0  ;;  %v556_v63 = vsel %vm534_vm0, %v2123_v3, 0.0  ;;  %v607_v58 = vsel %vm534_vm0, %v2122_v2, -inf  ;;  %v621_v25 = vsel %vm534_vm0, %v2123_v3, -inf }
  0xd7   : > { %2396 = vmatpush1.bf16.msra.mxu1 %v2395_v29  ;;  %2334 = vmatprep.subr.bf16.mxu0 %v2333_v30  ;;  %v543_v57 = vrot.slane %v542_v0, 4  ;;  %v557_v56 = vrot.slane %v556_v63, 4  ;;  %v570_v52 = vsel %vm534_vm0, %v2124_v19, 0.0  ;;  %v584_v51 = vsel %vm534_vm0, %v2125_v23, 0.0 }
  0xd8   : > { %2398 = vmatprep.subr.bf16.mxu1 %v2397_v31  ;;  %v571_v50 = vrot.slane %v570_v52, 4  ;;  %v585_v62 = vrot.slane %v584_v51, 4  ;;  %v608_v18 = vrot.slane %v607_v58, 4  ;;  %v622_v29 = vrot.slane %v621_v25, 4 }
  0xd9   : > { %v544_v30 = vadd.f32 %v543_v57, %v542_v0  ;;  %v558_v46 = vadd.f32 %v557_v56, %v556_v63  ;;  %v635_v45 = vsel %vm534_vm0, %v2124_v19, -inf  ;;  %v649_v2 = vsel %vm534_vm0, %v2125_v23, -inf }
  0xda   : > { %2336 = vmatpush1.bf16.msra.mxu0 %v2335_v32  ;;  %v572_v31 = vadd.f32 %v571_v50, %v570_v52  ;;  %v586_v3 = vadd.f32 %v585_v62, %v584_v51  ;;  %v609_v44 = vmax.f32 %v607_v58, %v608_v18  ;;  %v636_v43 = vrot.slane %v635_v45, 4  ;;  %v512_v62 = vld [vmem:[%s3348_s15 + $0x10] sm:$0xff] }
  0xdb   : > { %2400 = vmatpush1.bf16.msra.mxu1 %v2399_v36  ;;  %2338 = vmatprep.subr.bf16.mxu0 %v2337_v37  ;;  %v545_v32 = vrot.slane %v544_v30, 2  ;;  %v559_v56 = vrot.slane %v558_v46, 2  ;;  %v623_v57 = vmax.f32 %v621_v25, %v622_v29  ;;  %v650_v63 = vrot.slane %v649_v2, 4 }
  0xdc   : > { %2402 = vmatprep.subr.bf16.mxu1 %v2401_v38  ;;  %v573_v0 = vrot.slane %v572_v31, 2  ;;  %v587_v19 = vrot.slane %v586_v3, 2  ;;  %v610_v4 = vrot.slane %v609_v44, 2  ;;  %v637_v5 = vmax.f32 %v635_v45, %v636_v43 }
  0xdd   : > { %v546_v6 = vadd.f32 %v545_v32, %v544_v30  ;;  %v560_v7 = vadd.f32 %v559_v56, %v558_v46  ;;  %v624_v36 = vrot.slane %v623_v57, 2  ;;  %v651_v37 = vmax.f32 %v649_v2, %v650_v63 }
  0xde   : > { %2340 = vmatpush1.bf16.msra.mxu0 %v2339_v39  ;;  %v574_v38 = vadd.f32 %v573_v0, %v572_v31  ;;  %v588_v43 = vadd.f32 %v587_v19, %v586_v3  ;;  %v611_v45 = vmax.f32 %v609_v44, %v610_v4  ;;  %v638_v50 = vrot.slane %v637_v5, 2 }
  0xdf   : > { %2404 = vmatpush1.bf16.msra.mxu1 %v3819_v8  ;;  %2342 = vmatprep.subr.bf16.mxu0 %v3820_v9  ;;  %v547_v11 = vrot.slane %v546_v6, 1  ;;  %v561_v39 = vrot.slane %v560_v7, 1  ;;  %v625_v46 = vmax.f32 %v623_v57, %v624_v36  ;;  %v652_v51 = vrot.slane %v651_v37, 2 }
  0xe0   : > { %2406 = vmatprep.subr.bf16.mxu1 %v3821_v10  ;;  %v575_v12 = vrot.slane %v574_v38, 1  ;;  %v589_v13 = vrot.slane %v588_v43, 1  ;;  %v612_v52 = vrot.slane %v611_v45, 1  ;;  %v639_v58 = vmax.f32 %v637_v5, %v638_v50 }
  0xe1   : > { %v548_v15 = vadd.f32 %v547_v11, %v546_v6  ;;  %v562_v44 = vadd.f32 %v561_v39, %v560_v7  ;;  %v626_v23 = vrot.slane %v625_v46, 1  ;;  %v653_v25 = vmax.f32 %v651_v37, %v652_v51 }
  0xe2   : > { %2344 = vmatpush1.bf16.msra.mxu0 %v3822_v14  ;;  %v576_v18 = vadd.f32 %v575_v12, %v574_v38  ;;  %v590_v29 = vadd.f32 %v589_v13, %v588_v43  ;;  %v613_v30 = vmax.f32 %v611_v45, %v612_v52  ;;  %v640_v2 = vrot.slane %v639_v58, 1 }
  0xe3   : > { %2408 = vmatpush1.bf16.msra.mxu1 %v3823_v16  ;;  %2346 = vmatprep.subr.bf16.mxu0 %v3824_v17  ;;  %v593_v21 = vmul.f32 0.25, %v548_v15  ;;  %v595_v31 = vmul.f32 0.25, %v562_v44  ;;  %v627_v3 = vmax.f32 %v625_v46, %v626_v23  ;;  %v654_v32 = vrot.slane %v653_v25, 1 }
  0xe4   : > { %2410 = vmatprep.subr.bf16.mxu1 %v3825_v20  ;;  %v597_v56 = vmul.f32 0.25, %v576_v18  ;;  %v599_v57 = vmul.f32 0.25, %v590_v29  ;;  %v641_v22 = vmax.f32 %v639_v58, %v640_v2  ;;  %v3448_v26 = vcombine.low %v512_v62, %v3394_v1 }
  0xe5   : > { %v655_v28 = vmax.f32 %v653_v25, %v654_v32  ;;  %v657_v63 = vadd.f32 %v613_v30, %v593_v21  ;;  %v659_v0 = vadd.f32 %v627_v3, %v595_v31  ;;  %v3454_v33 = vcombine.high %v512_v62, %v3394_v1 }
  0xe6   : > { %2348 = vmatpush1.bf16.msra.mxu0 %v3826_v27  ;;  %v3828_v19 = vpack.c.bf16 %v3360_v48, %v3358_v47  ;;  %v661_v4 = vadd.f32 %v641_v22, %v597_v56  ;;  %v535_v5 = vsel %vm534_vm0, %v3401_v24, 0.0  ;;  %v549_v35 = vsel %vm534_vm0, %v3403_v59, 0.0 }
  0xe7   : > { %2412 = vmatpush1.bf16.msra.mxu1 %v3827_v34  ;;  %v563_v40 = vsel %vm534_vm0, %v3448_v26, 0.0  ;;  %v3829_v1 = vpack.c.bf16 %v3370_v53, %v3362_v49  ;;  %v663_v41 = vadd.f32 %v655_v28, %v599_v57  ;;  %v742_v42 = vsel %vm736_vm1, %v659_v0, %v657_v63  ;;  %v989_v28 = vld [vmem:[#allocation7 + $0x80] sm:$0xff]  ;;  %v990_v63 = vld [vmem:[#allocation7 + $0x88] sm:$0xff] }
  0xe8   : > { %2350 = vmatprep.subr.bf16.mxu0 %v3828_v19  ;;  %v536_v6 = vrot.slane %v535_v5, 4  ;;  %v550_v47 = vrot.slane %v549_v35, 4  ;;  %v743_v48 = vsel %vm738_vm2, %v661_v4, %v742_v42  ;;  %v564_v7 = vrot.slane %v563_v40, 4 }
  0xe9   : > { %2414 = vmatprep.subr.bf16.mxu1 %v3829_v1  ;;  %v577_v36 = vsel %vm534_vm0, %v3454_v33, 0.0  ;;  %v600_v37 = vsel %vm534_vm0, %v3401_v24, -inf  ;;  %v3830_v8 = vpack.c.bf16 %v3374_v55, %v3372_v54  ;;  %v744_v49 = vsel %vm740_vm3, %v663_v41, %v743_v48 }
  0xea   : > { %v537_v53 = vadd.f32 %v536_v6, %v535_v5  ;;  %v551_v9 = vadd.f32 %v550_v47, %v549_v35  ;;  %v578_v38 = vrot.slane %v577_v36, 4  ;;  %v3831_v43 = vpack.c.bf16 %v3386_v61, %v3384_v60  ;;  %811 = vmatprep.mubr.f32.mxu0 %v744_v49  ;;  %946 = vmatprep.mubr.f32.mxu1 %v744_v49 }
  0xeb   : > { %2352 = vmatpush1.bf16.msra.mxu0 %v3830_v8  ;;  %v565_v45 = vadd.f32 %v564_v7, %v563_v40  ;;  %v601_v50 = vrot.slane %v600_v37, 4  ;;  %v614_v10 = vsel %vm534_vm0, %v3403_v59, -inf  ;;  %v628_v11 = vsel %vm534_vm0, %v3448_v26, -inf  ;;  %v974_v8 = vld [vmem:[#allocation7 + $0x8] sm:$0xff] }
  0xec   : > { %2416 = vmatpush1.bf16.msra.mxu1 %v3831_v43  ;;  %v538_v54 = vrot.slane %v537_v53, 2  ;;  %v552_v55 = vrot.slane %v551_v9, 2  ;;  %v579_v39 = vadd.f32 %v578_v38, %v577_v36  ;;  %v615_v46 = vrot.slane %v614_v10, 4  ;;  %v992_v38 = vld [vmem:[#allocation7 + $0x98] sm:$0xff] }
  0xed   : > { %v566_v51 = vrot.slane %v565_v45, 2  ;;  %v602_v12 = vmax.f32 %v600_v37, %v601_v50  ;;  %v629_v13 = vrot.slane %v628_v11, 4  ;;  %v642_v60 = vsel %vm534_vm0, %v3454_v33, -inf  ;;  %v973_v37 = vld [vmem:[#allocation7] sm:$0xff] }
  0xee   : > { %v539_v61 = vadd.f32 %v538_v54, %v537_v53  ;;  %v553_v52 = vadd.f32 %v552_v55, %v551_v9  ;;  %v580_v58 = vrot.slane %v579_v39, 2  ;;  %v616_v14 = vmax.f32 %v614_v10, %v615_v46  ;;  %v991_v9 = vld [vmem:[#allocation7 + $0x90] sm:$0xff]  ;;  %v976_v55 = vld [vmem:[#allocation7 + $0x18] sm:$0xff]  ;;  %v993_v46 = vld [vmem:[#allocation7 + $0xa0] sm:$0xff] }
  0xef   : > { %v567_v15 = vadd.f32 %v566_v51, %v565_v45  ;;  %v603_v44 = vrot.slane %v602_v12, 2  ;;  %v630_v23 = vmax.f32 %v628_v11, %v629_v13  ;;  %v643_v25 = vrot.slane %v642_v60, 4  ;;  %v975_v54 = vld [vmem:[#allocation7 + $0x10] sm:$0xff]  ;;  %v994_v51 = vld [vmem:[#allocation7 + $0xa8] sm:$0xff] }
  0xf0   : > { %v540_v62 = vrot.slane %v539_v61, 1  ;;  %v554_v16 = vrot.slane %v553_v52, 1  ;;  %v581_v17 = vadd.f32 %v580_v58, %v579_v39  ;;  %v617_v18 = vrot.slane %v616_v14, 2  ;;  %v995_v58 = vld [vmem:[#allocation7 + $0xb0] sm:$0xff] }
  0xf1   : > { %v568_v29 = vrot.slane %v567_v15, 1  ;;  %v604_v30 = vmax.f32 %v602_v12, %v603_v44  ;;  %v631_v2 = vrot.slane %v630_v23, 2  ;;  %v644_v20 = vmax.f32 %v642_v60, %v643_v25  ;;  %v977_v60 = vld [vmem:[#allocation7 + $0x20] sm:$0xff]  ;;  %v979_v44 = vld [vmem:[#allocation7 + $0x30] sm:$0xff] }
  0xf2   : > { %v541_v21 = vadd.f32 %v540_v62, %v539_v61  ;;  %v555_v31 = vadd.f32 %v554_v16, %v553_v52  ;;  %v582_v3 = vrot.slane %v581_v17, 1  ;;  %v618_v32 = vmax.f32 %v616_v14, %v617_v18  ;;  %v978_v61 = vld [vmem:[#allocation7 + $0x28] sm:$0xff]  ;;  %v996_v14 = vld [vmem:[#allocation7 + $0xb8] sm:$0xff]  ;;  %v997_v62 = vld [vmem:[#allocation7 + $0xc0] sm:$0xff] }
  0xf3   : > { %v569_v56 = vadd.f32 %v568_v29, %v567_v15  ;;  %v605_v57 = vrot.slane %v604_v30, 1  ;;  %v632_v22 = vmax.f32 %v630_v23, %v631_v2  ;;  %v645_v27 = vrot.slane %v644_v20, 2  ;;  %v980_v23 = vld [vmem:[#allocation7 + $0x38] sm:$0xff]  ;;  %v998_v16 = vld [vmem:[#allocation7 + $0xc8] sm:$0xff]  ;;  %v981_v18 = vld [vmem:[#allocation7 + $0x40] sm:$0xff] }
  0xf4   : > { %v583_v0 = vadd.f32 %v582_v3, %v581_v17  ;;  %v592_v34 = vmul.f32 0.25, %v541_v21  ;;  %v594_v19 = vmul.f32 0.25, %v555_v31  ;;  %v619_v4 = vrot.slane %v618_v32, 1  ;;  %v982_v29 = vld [vmem:[#allocation7 + $0x48] sm:$0xff]  ;;  %v983_v21 = vld [vmem:[#allocation7 + $0x50] sm:$0xff]  ;;  %v984_v31 = vld [vmem:[#allocation7 + $0x58] sm:$0xff] }
  0xf5   : > { %v596_v5 = vmul.f32 0.25, %v569_v56  ;;  %v606_v35 = vmax.f32 %v604_v30, %v605_v57  ;;  %v633_v40 = vrot.slane %v632_v22, 1  ;;  %v646_v1 = vmax.f32 %v644_v20, %v645_v27  ;;  %v999_v30 = vld [vmem:[#allocation7 + $0xd0] sm:$0xff]  ;;  %v1000_v20 = vld [vmem:[#allocation7 + $0xd8] sm:$0xff]  ;;  %v1002_v56 = vld [vmem:[#allocation7 + $0xe8] sm:$0xff] }
  0xf6   : > { %v620_v41 = vmax.f32 %v618_v32, %v619_v4  ;;  %v2417_v42 = vpack.c.bf16 %v990_v63, %v989_v28  ;;  %v598_v6 = vmul.f32 0.25, %v583_v0  ;;  %v2419_v10 = vpack.c.bf16 %v974_v8, %v973_v37  ;;  %v1001_v32 = vld [vmem:[#allocation7 + $0xe0] sm:$0xff]  ;;  %v986_v28 = vld [vmem:[#allocation7 + $0x68] sm:$0xff]  ;;  %v1003_v63 = vld [vmem:[#allocation7 + $0xf0] sm:$0xff] }
  0xf7   : > { %v634_v47 = vmax.f32 %v632_v22, %v633_v40  ;;  %v647_v48 = vrot.slane %v646_v1, 1  ;;  %v656_v7 = vadd.f32 %v606_v35, %v592_v34  ;;  %v2421_v11 = vpack.c.bf16 %v992_v38, %v991_v9  ;;  %v985_v27 = vld [vmem:[#allocation7 + $0x60] sm:$0xff]  ;;  %v1004_v0 = vld [vmem:[#allocation7 + $0xf8] sm:$0xff]  ;;  %v987_v4 = vld [vmem:[#allocation7 + $0x70] sm:$0xff] }
  0xf8   : > { %v658_v36 = vadd.f32 %v620_v41, %v594_v19  ;;  %2418 = vmatprep.subr.bf16.mxu0 %v2417_v42  ;;  %v2423_v12 = vpack.c.bf16 %v976_v55, %v975_v54  ;;  %v2425_v13 = vpack.c.bf16 %v994_v51, %v993_v46  ;;  %v2427_v52 = vpack.c.bf16 %v978_v61, %v977_v60  ;;  %v1164_v55 = vld [vmem:[#allocation10] sm:$0xff] }
  0xf9   : > { %v648_v49 = vmax.f32 %v646_v1, %v647_v48  ;;  %v660_v53 = vadd.f32 %v634_v47, %v596_v5  ;;  %v2429_v15 = vpack.c.bf16 %v996_v14, %v995_v58  ;;  %v2431_v25 = vpack.c.bf16 %v980_v23, %v979_v44  ;;  %v988_v5 = vld [vmem:[#allocation7 + $0x78] sm:$0xff]  ;;  %v1168_v61 = vld [vmem:[#allocation10 + $0x20] sm:$0xff]  ;;  %v1170_v14 = vld [vmem:[#allocation10 + $0x30] sm:$0xff] }
  0xfa   : > { %v737_v43 = vsel %vm736_vm1, %v658_v36, %v656_v7  ;;  %v2433_v17 = vpack.c.bf16 %v998_v16, %v997_v62  ;;  %v2435_v2 = vpack.c.bf16 %v982_v29, %v981_v18  ;;  %v2437_v3 = vpack.c.bf16 %v1000_v20, %v999_v30  ;;  %v1172_v23 = vld [vmem:[#allocation10 + $0x40] sm:$0xff]  ;;  %v1174_v16 = vld [vmem:[#allocation10 + $0x50] sm:$0xff]  ;;  %v1177_v30 = vld [vmem:[#allocation10 + $0x68] sm:$0xff] }
  0xfb   : > { %v662_v45 = vadd.f32 %v648_v49, %v598_v6  ;;  %v739_v50 = vsel %vm738_vm2, %v660_v53, %v737_v43  ;;  %v2439_v57 = vpack.c.bf16 %v984_v31, %v983_v21  ;;  %v2441_v22 = vpack.c.bf16 %v1002_v56, %v1001_v32  ;;  %v1176_v29 = vld [vmem:[#allocation10 + $0x60] sm:$0xff]  ;;  %v1181_v21 = vld [vmem:[#allocation10 + $0x88] sm:$0xff] }
  0xfc   : > { %v2443_v34 = vpack.c.bf16 %v986_v28, %v985_v27  ;;  %v2445_v19 = vpack.c.bf16 %v1004_v0, %v1003_v63  ;;  %v2447_v35 = vpack.c.bf16 %v988_v5, %v987_v4  ;;  %v2954_v54 = vmov 0.0   ;;  %v1180_v20 = vld [vmem:[#allocation10 + $0x80] sm:$0xff]  ;;  %v1183_v27 = vld [vmem:[#allocation10 + $0x98] sm:$0xff]  ;;  %v1185_v0 = vld [vmem:[#allocation10 + $0xa8] sm:$0xff] }
  0xfd   : > { %v741_v39 = vsel %vm740_vm3, %v662_v45, %v739_v50  ;;  %v2956_v46 = vmov 0.0|0.0   ;;  %v1075_v56 = vld [vmem:[%s3789_s7] sm:$0xf]  ;;  %v1187_v4 = vld [vmem:[#allocation10 + $0xb8] sm:$0xff] }
  0xfe   : > { %812 = vmatmul.mubr.f32.vlgmr.msra.gmra.mrb[0].mxu0 %v741_v39  ;;  %947 = vmatmul.mubr.f32.vlgmr.msra.gmra.mrb[0].mxu1 %v741_v39  ;;  %v1165_v39 = vld [vmem:[#allocation10 + $0x8] sm:$0xff]  ;;  %v1184_v63 = vld [vmem:[#allocation10 + $0xa0] sm:$0xff] }
  0xff   : > { %2420 = vmatpush3.bf16.msra.mxu0 %v2419_v10  ;;  %2246 = vmatprep.mubr.msk.f32.mxu1 %vm2955_vm8, %v2954_v54  ;;  %v2450_v51 = vpack.c.bf16 %v1165_v39, %v1164_v55  ;;  %v1157_v55 = vlaneseq }
 0x100   : > { %2422 = vmatprep.subr.bf16.mxu0 %v2421_v11  ;;  %2449 = vmatprep.subr.bf16.mxu1 %v2956_v46 }
 0x101   : > { %2451 = vmatpush3.bf16.msra.mxu1 %v2450_v51  ;;  %v3538_v51 = vshrl.u32 %v1157_v55, 7  ;;  %v1462_v55 = vld [vmem:[#allocation9 + $0xa0] sm:$0xff] }
 0x102   : > { %2452 = vmatprep.subr.bf16.mxu1 %v2956_v46 }
 0x103   : > { %2424 = vmatpush3.bf16.msra.mxu0 %v2423_v12  ;;  %v1166_v12 = vld [vmem:[#allocation10 + $0x10] sm:$0xff] }
 0x104   : > { %2426 = vmatprep.subr.bf16.mxu0 %v2425_v13  ;;  %v1167_v13 = vld [vmem:[#allocation10 + $0x18] sm:$0xff] }
 0x105   : > { %v2453_v60 = vpack.c.bf16 %v1167_v13, %v1166_v12 }
 0x107   : > { %2428 = vmatpush3.bf16.msra.mxu0 %v2427_v52  ;;  %v1169_v52 = vld [vmem:[#allocation10 + $0x28] sm:$0xff]  ;;  %2454 = vmatpush3.bf16.msra.mxu1 %v2453_v60 }
 0x108   : > { %2430 = vmatprep.subr.bf16.mxu0 %v2429_v15  ;;  %v2456_v58 = vpack.c.bf16 %v1169_v52, %v1168_v61  ;;  %2455 = vmatprep.subr.bf16.mxu1 %v2956_v46  ;;  %v1171_v15 = vld [vmem:[#allocation10 + $0x38] sm:$0xff]  ;;  %v2128_v52 = vld [vmem:[%s3792_s10] ss:$0 sm:$0xff] }
 0x109   : > { %v2459_v44 = vpack.c.bf16 %v1171_v15, %v1170_v14  ;;  %v2129_v14 = vld [vmem:[%s3792_s10 + $0x1] ss:$0 sm:$0xff] }
 0x10b   : > { %2432 = vmatpush3.bf16.msra.mxu0 %v2431_v25  ;;  %2457 = vmatpush3.bf16.msra.mxu1 %v2456_v58  ;;  %v1173_v25 = vld [vmem:[#allocation10 + $0x48] sm:$0xff] }
 0x10c   : > { %2434 = vmatprep.subr.bf16.mxu0 %v2433_v17  ;;  %2458 = vmatprep.subr.bf16.mxu1 %v2956_v46  ;;  %v2462_v62 = vpack.c.bf16 %v1173_v25, %v1172_v23  ;;  %v1175_v17 = vld [vmem:[#allocation10 + $0x58] sm:$0xff] }
 0x10d   : > { %v2465_v18 = vpack.c.bf16 %v1175_v17, %v1174_v16 }
 0x10f   : > { %2436 = vmatpush3.bf16.msra.mxu0 %v2435_v2  ;;  %2460 = vmatpush3.bf16.msra.mxu1 %v2459_v44  ;;  %v2468_v2 = vpack.c.bf16 %v1177_v30, %v1176_v29  ;;  %v1445_v29 = vld [vmem:[#allocation9 + $0x18] sm:$0xff] }
 0x110   : > { %2438 = vmatprep.subr.bf16.mxu0 %v2437_v3  ;;  %2461 = vmatprep.subr.bf16.mxu1 %v2956_v46 }
 0x113   : > { %2440 = vmatpush3.bf16.msra.mxu0 %v2439_v57  ;;  %2463 = vmatpush3.bf16.msra.mxu1 %v2462_v62  ;;  %v2474_v57 = vpack.c.bf16 %v1181_v21, %v1180_v20  ;;  %v1442_v20 = vld [vmem:[#allocation9] sm:$0xff]  ;;  %v1444_v21 = vld [vmem:[#allocation9 + $0x10] sm:$0xff] }
 0x114   : > { %2442 = vmatprep.subr.bf16.mxu0 %v2441_v22  ;;  %2464 = vmatprep.subr.bf16.mxu1 %v2956_v46  ;;  %v1182_v22 = vld [vmem:[#allocation10 + $0x90] sm:$0xff] }
 0x115   : > { %v2477_v28 = vpack.c.bf16 %v1183_v27, %v1182_v22  ;;  %v1356_v22 = vld [vmem:[%s3790_s8] sm:$0xf]  ;;  %v2499_v27 = vpack.c.bf16 %v1444_v21, %v1442_v20  ;;  %v1551_v20 = vld [vmem:[#allocation6 + $0x10] sm:$0xff] }
 0x117   : > { %2444 = vmatpush3.bf16.msra.mxu0 %v2443_v34  ;;  %2466 = vmatpush3.bf16.msra.mxu1 %v2465_v18  ;;  %v2480_v34 = vpack.c.bf16 %v1185_v0, %v1184_v63  ;;  %v1443_v18 = vld [vmem:[#allocation9 + $0x8] sm:$0xff]  ;;  %v1446_v63 = vld [vmem:[#allocation9 + $0x20] sm:$0xff]  ;;  %v1448_v0 = vld [vmem:[#allocation9 + $0x30] sm:$0xff] }
 0x118   : > { %2446 = vmatprep.subr.bf16.mxu0 %v2445_v19  ;;  %2467 = vmatprep.subr.bf16.mxu1 %v2956_v46  ;;  %v1186_v19 = vld [vmem:[#allocation10 + $0xb0] sm:$0xff] }
 0x119   : > { %v2483_v5 = vpack.c.bf16 %v1187_v4, %v1186_v19  ;;  %v1453_v19 = vld [vmem:[#allocation9 + $0x58] sm:$0xff]  ;;  %v2503_v4 = vpack.c.bf16 %v1448_v0, %v1446_v63 }
 0x11a   : > { %v1560_v63 = vld [vmem:[#allocation6 + $0x58] sm:$0xff] }
 0x11b   : > { %2448 = vmatpush3.bf16.msra.mxu0 %v2447_v35  ;;  %2469 = vmatpush3.bf16.msra.mxu1 %v2468_v2  ;;  %v1188_v35 = vld [vmem:[#allocation10 + $0xc0] sm:$0xff] }
 0x11c   : > { %2209 = vmatprep.subr.mxu0 %v2954_v54  ;;  %2470 = vmatprep.subr.bf16.mxu1 %v2956_v46 }
 0x1d1   : > { %v3493_v40 = vpop.f32.mrb[0].mxu0  ;;  %v3495_v1 = vpop.f32.mrb[0].mxu1 }
 0x1d2   : > { %v953_v41 = vmul.f32 %v3493_v40, %v3493_v40  ;;  %v955_v42 = vmul.f32 %v3495_v1, %v3495_v1  ;;  %v3501_v6 = vpop.f32.mrb[1].mxu0  ;;  %v3503_v47 = vpop.f32.mrb[1].mxu1 }
 0x1d3   : > { %v954_v48 = vmul.f32 %v3501_v6, %v3501_v6  ;;  %v956_v7 = vmul.f32 %v3503_v47, %v3503_v47 }
 0x1d4   : > { %v957_v36 = vadd.f32 %v955_v42, %v953_v41  ;;  %v1189_v41 = vld [vmem:[#allocation10 + $0xc8] sm:$0xff] }
 0x1d5   : > { %v958_v37 = vadd.f32 %v956_v7, %v954_v48  ;;  %v2486_v42 = vpack.c.bf16 %v1189_v41, %v1188_v35  ;;  %v1190_v48 = vld [vmem:[#allocation10 + $0xd0] sm:$0xff]  ;;  %v1191_v7 = vld [vmem:[#allocation10 + $0xd8] sm:$0xff]  ;;  %v1450_v35 = vld [vmem:[#allocation9 + $0x40] sm:$0xff] }
 0x1d6   : > { %2746 = vrsqrt.f32 %v957_v36  ;;  %vm961_vm4 = vcmp.eq.f32.partialorder %v957_v36, inf  ;;  %v964_v50 = vand.u32 2147483648, %v957_v36  ;;  %vm963_vm7 = vcmp.eq.f32.partialorder %v957_v36, 0.0  ;;  %v1452_v41 = vld [vmem:[#allocation9 + $0x50] sm:$0xff] }
 0x1d7   : > { %2748 = vrsqrt.f32 %v958_v37  ;;  %vm968_vm5 = vcmp.eq.f32.partialorder %v958_v37, inf  ;;  %v971_v38 = vand.u32 2147483648, %v958_v37  ;;  %vm970_vm6 = vcmp.eq.f32.partialorder %v958_v37, 0.0 }
 0x1e0   : > { %v2747_v8 = vpop.eup %2746 }
 0x1e1   : > { %v2749_v49 = vpop.eup %2748  ;;  %v960_v53 = vmul.f32 %v2747_v8, %v957_v36  ;;  %v1193_v8 = vld [vmem:[#allocation10 + $0xe8] sm:$0xff] }
 0x1e2   : > { %v967_v9 = vmul.f32 %v2749_v49, %v958_v37 }
 0x1e3   : > { %v962_v43 = vsel %vm961_vm4, %v957_v36, %v960_v53  ;;  %v2489_v36 = vpack.c.bf16 %v1191_v7, %v1190_v48  ;;  %v1178_v53 = vld [vmem:[#allocation10 + $0x70] sm:$0xff]  ;;  %v1457_v48 = vld [vmem:[#allocation9 + $0x78] sm:$0xff]  ;;  %v2507_v7 = vpack.c.bf16 %v1452_v41, %v1450_v35 }
 0x1e4   : > { %v969_v45 = vsel %vm968_vm5, %v958_v37, %v967_v9  ;;  %v965_v11 = vsel %vm963_vm7, %v964_v50, %v962_v43  ;;  %v1192_v37 = vld [vmem:[#allocation10 + $0xe0] sm:$0xff]  ;;  %v1179_v9 = vld [vmem:[#allocation10 + $0x78] sm:$0xff]  ;;  %v1194_v43 = vld [vmem:[#allocation10 + $0xf0] sm:$0xff] }
 0x1e5   : > { %v972_v10 = vsel %vm970_vm6, %v971_v38, %v969_v45  ;;  %v2492_v49 = vpack.c.bf16 %v1193_v8, %v1192_v37  ;;  %v2471_v38 = vpack.c.bf16 %v1179_v9, %v1178_v53  ;;  %v1195_v45 = vld [vmem:[#allocation10 + $0xf8] sm:$0xff]  ;;  %v1454_v37 = vld [vmem:[#allocation9 + $0x60] sm:$0xff]  ;;  %v1456_v8 = vld [vmem:[#allocation9 + $0x70] sm:$0xff] }
 0x1e6   : > { %1069 = vmatprep.mubr.f32.mxu0 %v972_v10  ;;  %v2495_v50 = vpack.c.bf16 %v1195_v45, %v1194_v43  ;;  %v2957_v10 = vmov 1983009808   ;;  %v1461_v53 = vld [vmem:[#allocation9 + $0x98] sm:$0xff]  ;;  %v2511_v9 = vpack.c.bf16 %v1456_v8, %v1454_v37  ;;  %v1458_v43 = vld [vmem:[#allocation9 + $0x80] sm:$0xff]  ;;  %v1463_v45 = vld [vmem:[#allocation9 + $0xa8] sm:$0xff] }
 0x1e7   : > { %1070 = vmatmul.mubr.f32.vlgmr.msra.gmra.mrb[2].mxu0 %v965_v11  ;;  %2472 = vmatpush3.bf16.msra.mxu1 %v2471_v38  ;;  %v1155_v11 = vunpack.c.l.s4 %v2957_v10  ;;  %v1564_v35 = vld [vmem:[#allocation6 + $0x78] sm:$0xff] }
 0x1e8   : > { %2211 = vmatprep.mubr.msk.f32.mxu0 %vm2955_vm8, %v2954_v54  ;;  %2284 = vmatprep.subr.mxu1 %v2954_v54  ;;  %v1568_v37 = vld [vmem:[#allocation6 + $0x98] sm:$0xff] }
 0x1e9   : > { %v1156_v39 = vunpack.c.0.s8 %v1155_v11 }
 0x1eb   : > { %v1159_v12 = vsub.s32 %v1156_v39, %v3538_v51  ;;  %v1464_v39 = vld [vmem:[#allocation9 + $0xb0] sm:$0xff] }
 0x2ba   : > { %v2168_v31 = vpop.f32.mrb[2].mxu0 }
 0x2bb   : > { %v2169_v3 = vpop.f32.mrb[3].mxu0 }
 0x2bc   : > { %v2170_v32 = vadd.f32 %v2169_v3, %v2168_v31  ;;  %v1447_v3 = vld [vmem:[#allocation9 + $0x28] sm:$0xff] }
 0x2be   : > { %2210 = vmatpush3.msk.msra.mxu0 %vm534_vm0, %v2170_v32  ;;  %v1449_v32 = vld [vmem:[#allocation9 + $0x38] sm:$0xff] }
 0x2bf   : > { %2212 = vmatmul.mubr.msk.f32.vlgmr.msra.gmra.mrb[4].mxu0 %vm1076_vm9, %v1075_v56  ;;  %2473 = vmatprep.subr.bf16.mxu0 %v2956_v46  ;;  %v2497_v56 = vpack.c.bf16 %v1445_v29, %v1443_v18  ;;  %v1685_v18 = vld [vmem:[%s3786_s4 + $0x8] sm:$0xff] }
 0x2c0   : > { %2475 = vmatpush3.bf16.msra.mxu0 %v2474_v57  ;;  %2281 = vmatprep.mubr.msk.f32.mxu0 %vm2955_vm8, %v2954_v54 }
 0x2c1   : > { %2476 = vmatprep.subr.bf16.mxu0 %v2956_v46 }
 0x2c4   : > { %2478 = vmatpush3.bf16.msra.mxu0 %v2477_v28  ;;  %v2501_v28 = vpack.c.bf16 %v1449_v32, %v1447_v3  ;;  %v1554_v3 = vld [vmem:[#allocation6 + $0x28] sm:$0xff]  ;;  %v1556_v32 = vld [vmem:[#allocation6 + $0x38] sm:$0xff] }
 0x2c5   : > { %2479 = vmatprep.subr.bf16.mxu0 %v2956_v46 }
 0x2c8   : > { %2481 = vmatpush3.bf16.msra.mxu0 %v2480_v34  ;;  %v1451_v34 = vld [vmem:[#allocation9 + $0x48] sm:$0xff] }
 0x2c9   : > { %2482 = vmatprep.subr.bf16.mxu0 %v2956_v46 }
 0x2cc   : > { %2484 = vmatpush3.bf16.msra.mxu0 %v2483_v5  ;;  %v2505_v5 = vpack.c.bf16 %v1453_v19, %v1451_v34  ;;  %v1557_v34 = vld [vmem:[#allocation6 + $0x40] sm:$0xff]  ;;  %v1559_v19 = vld [vmem:[#allocation6 + $0x50] sm:$0xff] }
 0x2cd   : > { %2485 = vmatprep.subr.bf16.mxu0 %v2956_v46 }
 0x2d0   : > { %2487 = vmatpush3.bf16.msra.mxu0 %v2486_v42  ;;  %v1455_v42 = vld [vmem:[#allocation9 + $0x68] sm:$0xff] }
 0x2d1   : > { %2488 = vmatprep.subr.bf16.mxu0 %v2956_v46 }
 0x2d4   : > { %2490 = vmatpush3.bf16.msra.mxu0 %v2489_v36  ;;  %v2509_v36 = vpack.c.bf16 %v1457_v48, %v1455_v42  ;;  %v1561_v42 = vld [vmem:[#allocation6 + $0x60] sm:$0xff]  ;;  %v1563_v48 = vld [vmem:[#allocation6 + $0x70] sm:$0xff] }
 0x2d5   : > { %2491 = vmatprep.subr.bf16.mxu0 %v2956_v46 }
 0x2d8   : > { %2493 = vmatpush3.bf16.msra.mxu0 %v2492_v49  ;;  %v1459_v49 = vld [vmem:[#allocation9 + $0x88] sm:$0xff] }
 0x2d9   : > { %2494 = vmatprep.subr.bf16.mxu0 %v2956_v46  ;;  %v2513_v38 = vpack.c.bf16 %v1461_v53, %v1459_v49  ;;  %v1565_v49 = vld [vmem:[#allocation6 + $0x80] sm:$0xff]  ;;  %v1567_v53 = vld [vmem:[#allocation6 + $0x90] sm:$0xff] }
 0x2dc   : > { %2496 = vmatpush3.bf16.msra.mxu0 %v2495_v50  ;;  %v1465_v50 = vld [vmem:[#allocation9 + $0xb8] sm:$0xff] }
 0x2dd   : > { %v2517_v11 = vpack.c.bf16 %v1465_v50, %v1463_v45  ;;  %v1569_v45 = vld [vmem:[#allocation6 + $0xa0] sm:$0xff]  ;;  %v1571_v50 = vld [vmem:[#allocation6 + $0xb0] sm:$0xff] }
 0x392   : > { %v1149_v13 = vpop.f32.mrb[4].mxu0 }
 0x393   : > { %v1160_v46 = vrot.slane %v1149_v13, %v1159_v12  ;;  %v2213_v60 = vpop.f32.mrb[5].mxu0  ;;  %v1469_v13 = vld [vmem:[#allocation9 + $0xd8] sm:$0xff] }
 0x395   : > { %v1161_v61 = vcombine.high %v1160_v46, %v1160_v46  ;;  %2247 = vmatmul.mubr.f32.vlgmr.msra.gmra.mrb[2].mxu1 %v1160_v46  ;;  %v2519_v46 = vpack.c.bf16 %v1464_v39, %v1462_v55  ;;  %v1576_v55 = vld [vmem:[#allocation6 + $0xd8] sm:$0xff] }
 0x396   : > { %2286 = vmatprep.mubr.msk.f32.mxu1 %vm2955_vm8, %v2954_v54 }
 0x397   : > { %2282 = vmatmul.mubr.f32.vlgmr.msra.gmra.mrb[6].mxu0 %v1161_v61  ;;  %v1466_v61 = vld [vmem:[#allocation9 + $0xc0] sm:$0xff] }
 0x468   : > { %v1276_v58 = vpop.f32.mrb[2].mxu1 }
 0x469   : > { %v1277_v15 = vadd.f32 %v2128_v52, %v1276_v58  ;;  %v2248_v44 = vpop.f32.mrb[3].mxu1  ;;  %v1468_v52 = vld [vmem:[#allocation9 + $0xd0] sm:$0xff]  ;;  %v1471_v58 = vld [vmem:[#allocation9 + $0xe8] sm:$0xff] }
 0x46a   : > { %v1346_v23 = vpop.f32.mrb[6].mxu0 }
 0x46b   : > { %v1352_v25 = vmul.f32 0.01, %v1277_v15  ;;  %v1347_v62 = vadd.f32 %v2129_v14, %v1346_v23  ;;  %v2283_v16 = vpop.f32.mrb[7].mxu0  ;;  %vm1350_vm10 = vcmp.ge.f32.partialorder %v1277_v15, 0.0  ;;  %v1473_v14 = vld [vmem:[#allocation9 + $0xf8] sm:$0xff]  ;;  %v1470_v23 = vld [vmem:[#allocation9 + $0xe0] sm:$0xff] }
 0x46c   : > { %v2525_v44 = vpack.c.bf16 %v1473_v14, %v1471_v58  ;;  %v1550_v16 = vld [vmem:[#allocation6 + $0x8] sm:$0xff]  ;;  %v1577_v58 = vld [vmem:[#allocation6 + $0xe0] sm:$0xff]  ;;  %v1579_v14 = vld [vmem:[#allocation6 + $0xf0] sm:$0xff] }
 0x46d   : > { %vm1351_vm11 = vcmp.ge.f32.partialorder %v1347_v62, 0.0  ;;  %v1353_v17 = vmul.f32 0.01, %v1347_v62  ;;  %v1354_v30 = vsel %vm1350_vm10, %v1277_v15, %v1352_v25  ;;  %v2523_v15 = vpack.c.bf16 %v1468_v52, %v1466_v61  ;;  %v1472_v25 = vld [vmem:[#allocation9 + $0xf0] sm:$0xff]  ;;  %v1580_v61 = vld [vmem:[#allocation6 + $0xf8] sm:$0xff] }
 0x46f   : > { %v1355_v2 = vsel %vm1351_vm11, %v1347_v62, %v1353_v17  ;;  %v2527_v62 = vpack.c.bf16 %v1472_v25, %v1470_v23  ;;  %v1552_v17 = vld [vmem:[#allocation6 + $0x18] sm:$0xff] }
 0x470   : > { %v1359_v31 = vcombine.low %v1354_v30, %v1355_v2  ;;  %v2529_v29 = vpack.c.bf16 %v1552_v17, %v1550_v16  ;;  %v1687_v30 = vld [vmem:[%s3786_s4 + $0x18] sm:$0xff]  ;;  %v1549_v2 = vld [vmem:[#allocation6] sm:$0xff]  ;;  %v1583_v16 = vld [vmem:[#allocation6 + $0x110] sm:$0xff] }
 0x471   : > { %v2593_v21 = vpack.c.bf16 %v1687_v30, %v1685_v18  ;;  %v1584_v23 = vld [vmem:[#allocation6 + $0x118] sm:$0xff]  ;;  %v1586_v18 = vld [vmem:[#allocation6 + $0x128] sm:$0xff] }
 0x472   : > { %v1366_v57 = vrot.slane %v1359_v31, %v1159_v12  ;;  %v1467_v12 = vld [vmem:[#allocation9 + $0xc8] sm:$0xff]  ;;  %v2531_v31 = vpack.c.bf16 %v1551_v20, %v1549_v2  ;;  %2530 = vmatprep.subr.bf16.mxu0 %v2529_v29  ;;  %v1588_v29 = vld [vmem:[#allocation6 + $0x138] sm:$0xff]  ;;  %v1585_v2 = vld [vmem:[#allocation6 + $0x120] sm:$0xff] }
 0x473   : > { %v2521_v60 = vpack.c.bf16 %v1469_v13, %v1467_v12  ;;  %v1573_v12 = vld [vmem:[#allocation6 + $0xc0] sm:$0xff]  ;;  %v1575_v13 = vld [vmem:[#allocation6 + $0xd0] sm:$0xff]  ;;  %v2565_v30 = vpack.c.bf16 %v1588_v29, %v1586_v18 }
 0x474   : > { %2285 = vmatpush3.msk.msra.mxu1 %vm534_vm0, %v1366_v57  ;;  %2532 = vmatpush1.bf16.msra.mxu0 %v2531_v31  ;;  %v1553_v57 = vld [vmem:[#allocation6 + $0x20] sm:$0xff]  ;;  %v1587_v20 = vld [vmem:[#allocation6 + $0x130] sm:$0xff]  ;;  %v1590_v31 = vld [vmem:[#allocation6 + $0x148] sm:$0xff] }
 0x475   : > { %2287 = vmatmul.mubr.msk.f32.vlgmr.msra.gmra.mrb[4].mxu1 %vm1076_vm9, %v1356_v22  ;;  %2498 = vmatprep.subr.bf16.mxu1 %v2497_v56  ;;  %v2533_v56 = vpack.c.bf16 %v1556_v32, %v1554_v3  ;;  %v1555_v22 = vld [vmem:[#allocation6 + $0x30] sm:$0xff]  ;;  %v1592_v3 = vld [vmem:[#allocation6 + $0x158] sm:$0xff]  ;;  %v1696_v29 = vld [vmem:[%s3786_s4 + $0x60] sm:$0xff] }
 0x476   : > { %2500 = vmatpush1.bf16.msra.mxu1 %v2499_v27  ;;  %1538 = vmatprep.mubr.f32.mxu1 %v2954_v54  ;;  %v1460_v54 = vld [vmem:[#allocation9 + $0x90] sm:$0xff]  ;;  %v2535_v27 = vpack.c.bf16 %v1555_v22, %v1553_v57  ;;  %v2569_v32 = vpack.c.bf16 %v1592_v3, %v1590_v31  ;;  %v1700_v3 = vld [vmem:[%s3786_s4 + $0x80] sm:$0xff] }
 0x477   : > { %2502 = vmatprep.subr.bf16.mxu1 %v2501_v28  ;;  %v2515_v10 = vpack.c.bf16 %v1460_v54, %v1458_v43  ;;  %v1558_v28 = vld [vmem:[#allocation6 + $0x48] sm:$0xff]  ;;  %2534 = vmatprep.subr.bf16.mxu0 %v2533_v56  ;;  %v1572_v43 = vld [vmem:[#allocation6 + $0xb8] sm:$0xff]  ;;  %v1589_v56 = vld [vmem:[#allocation6 + $0x140] sm:$0xff] }
 0x478   : > { %v2537_v0 = vpack.c.bf16 %v1560_v63, %v1558_v28  ;;  %2536 = vmatpush1.bf16.msra.mxu0 %v2535_v27  ;;  %v1591_v57 = vld [vmem:[#allocation6 + $0x150] sm:$0xff]  ;;  %v1594_v27 = vld [vmem:[#allocation6 + $0x168] sm:$0xff]  ;;  %v1596_v28 = vld [vmem:[#allocation6 + $0x178] sm:$0xff] }
 0x479   : > { %v2571_v22 = vpack.c.bf16 %v1591_v57, %v1589_v56  ;;  %v2573_v63 = vpack.c.bf16 %v1596_v28, %v1594_v27  ;;  %v1705_v56 = vld [vmem:[%s3786_s4 + $0xa8] sm:$0xff]  ;;  %v1707_v57 = vld [vmem:[%s3786_s4 + $0xb8] sm:$0xff]  ;;  %v1704_v28 = vld [vmem:[%s3786_s4 + $0xa0] sm:$0xff] }
 0x47a   : > { %2504 = vmatpush1.bf16.msra.mxu1 %v2503_v4  ;;  %v2539_v4 = vpack.c.bf16 %v1559_v19, %v1557_v34  ;;  %2538 = vmatprep.subr.bf16.mxu0 %v2537_v0  ;;  %v1593_v0 = vld [vmem:[#allocation6 + $0x160] sm:$0xff]  ;;  %v1595_v34 = vld [vmem:[#allocation6 + $0x170] sm:$0xff]  ;;  %v2613_v27 = vpack.c.bf16 %v1707_v57, %v1705_v56  ;;  %v1743_v56 = vld [vmem:[%s3786_s4 + $0x1d8] sm:$0xff] }
 0x47b   : > { %2506 = vmatprep.subr.bf16.mxu1 %v2505_v5  ;;  %v1562_v5 = vld [vmem:[#allocation6 + $0x68] sm:$0xff]  ;;  %v2575_v19 = vpack.c.bf16 %v1595_v34, %v1593_v0  ;;  %v1711_v34 = vld [vmem:[%s3786_s4 + $0xd8] sm:$0xff] }
 0x47c   : > { %v2541_v41 = vpack.c.bf16 %v1564_v35, %v1562_v5  ;;  %2540 = vmatpush1.bf16.msra.mxu0 %v2539_v4  ;;  %v1598_v4 = vld [vmem:[#allocation6 + $0x188] sm:$0xff]  ;;  %v1600_v5 = vld [vmem:[#allocation6 + $0x198] sm:$0xff] }
 0x47d   : > { %v2577_v35 = vpack.c.bf16 %v1600_v5, %v1598_v4  ;;  %v1709_v0 = vld [vmem:[%s3786_s4 + $0xc8] sm:$0xff]  ;;  %v1708_v5 = vld [vmem:[%s3786_s4 + $0xc0] sm:$0xff] }
 0x47e   : > { %2508 = vmatpush1.bf16.msra.mxu1 %v2507_v7  ;;  %v2543_v7 = vpack.c.bf16 %v1563_v48, %v1561_v42  ;;  %2542 = vmatprep.subr.bf16.mxu0 %v2541_v41  ;;  %v1597_v41 = vld [vmem:[#allocation6 + $0x180] sm:$0xff]  ;;  %v1599_v42 = vld [vmem:[#allocation6 + $0x190] sm:$0xff]  ;;  %v2617_v4 = vpack.c.bf16 %v1711_v34, %v1709_v0  ;;  %v1610_v0 = vld [vmem:[#allocation6 + $0x1e8] sm:$0xff] }
 0x47f   : > { %2510 = vmatprep.subr.bf16.mxu1 %v2509_v36  ;;  %v1566_v36 = vld [vmem:[#allocation6 + $0x88] sm:$0xff]  ;;  %v2579_v48 = vpack.c.bf16 %v1599_v42, %v1597_v41  ;;  %v1715_v42 = vld [vmem:[%s3786_s4 + $0xf8] sm:$0xff] }
 0x480   : > { %v2545_v8 = vpack.c.bf16 %v1568_v37, %v1566_v36  ;;  %2544 = vmatpush1.bf16.msra.mxu0 %v2543_v7  ;;  %v1602_v7 = vld [vmem:[#allocation6 + $0x1a8] sm:$0xff]  ;;  %v1604_v36 = vld [vmem:[#allocation6 + $0x1b8] sm:$0xff] }
 0x481   : > { %v2581_v37 = vpack.c.bf16 %v1604_v36, %v1602_v7  ;;  %v1713_v41 = vld [vmem:[%s3786_s4 + $0xe8] sm:$0xff]  ;;  %v1712_v36 = vld [vmem:[%s3786_s4 + $0xe0] sm:$0xff]  ;;  %v1612_v34 = vld [vmem:[#allocation6 + $0x1f8] sm:$0xff] }
 0x482   : > { %2512 = vmatpush1.bf16.msra.mxu1 %v2511_v9  ;;  %v2547_v9 = vpack.c.bf16 %v1567_v53, %v1565_v49  ;;  %2546 = vmatprep.subr.bf16.mxu0 %v2545_v8  ;;  %v1601_v8 = vld [vmem:[#allocation6 + $0x1a0] sm:$0xff]  ;;  %v1603_v49 = vld [vmem:[#allocation6 + $0x1b0] sm:$0xff]  ;;  %v2621_v7 = vpack.c.bf16 %v1715_v42, %v1713_v41 }
 0x483   : > { %2514 = vmatprep.subr.bf16.mxu1 %v2513_v38  ;;  %v1570_v38 = vld [vmem:[#allocation6 + $0xa8] sm:$0xff]  ;;  %v2583_v53 = vpack.c.bf16 %v1603_v49, %v1601_v8  ;;  %v1719_v49 = vld [vmem:[%s3786_s4 + $0x118] sm:$0xff]  ;;  %v1611_v41 = vld [vmem:[#allocation6 + $0x1f0] sm:$0xff] }
 0x484   : > { %v2549_v54 = vpack.c.bf16 %v1572_v43, %v1570_v38  ;;  %2548 = vmatpush1.bf16.msra.mxu0 %v2547_v9  ;;  %v1606_v9 = vld [vmem:[#allocation6 + $0x1c8] sm:$0xff]  ;;  %v1608_v38 = vld [vmem:[#allocation6 + $0x1d8] sm:$0xff] }
 0x485   : > { %v2585_v43 = vpack.c.bf16 %v1608_v38, %v1606_v9  ;;  %v1717_v8 = vld [vmem:[%s3786_s4 + $0x108] sm:$0xff]  ;;  %v1716_v38 = vld [vmem:[%s3786_s4 + $0x100] sm:$0xff] }
 0x486   : > { %2516 = vmatpush1.bf16.msra.mxu1 %v2515_v10  ;;  %v2551_v10 = vpack.c.bf16 %v1571_v50, %v1569_v45  ;;  %2550 = vmatprep.subr.bf16.mxu0 %v2549_v54  ;;  %v1605_v54 = vld [vmem:[#allocation6 + $0x1c0] sm:$0xff]  ;;  %v1607_v45 = vld [vmem:[#allocation6 + $0x1d0] sm:$0xff]  ;;  %v2625_v9 = vpack.c.bf16 %v1719_v49, %v1717_v8 }
 0x487   : > { %2518 = vmatprep.subr.bf16.mxu1 %v2517_v11  ;;  %v1574_v11 = vld [vmem:[#allocation6 + $0xc8] sm:$0xff]  ;;  %v2587_v50 = vpack.c.bf16 %v1607_v45, %v1605_v54  ;;  %v1723_v45 = vld [vmem:[%s3786_s4 + $0x138] sm:$0xff] }
 0x488   : > { %v2553_v39 = vpack.c.bf16 %v1576_v55, %v1574_v11  ;;  %2552 = vmatpush1.bf16.msra.mxu0 %v2551_v10  ;;  %v1684_v10 = vld [vmem:[%s3786_s4] sm:$0xff]  ;;  %v1686_v11 = vld [vmem:[%s3786_s4 + $0x10] sm:$0xff]  ;;  %v1689_v55 = vld [vmem:[%s3786_s4 + $0x28] sm:$0xff] }
 0x489   : > { %v1721_v54 = vld [vmem:[%s3786_s4 + $0x128] sm:$0xff] }
 0x48a   : > { %2520 = vmatpush1.bf16.msra.mxu1 %v2519_v46  ;;  %v2555_v46 = vpack.c.bf16 %v1575_v13, %v1573_v12  ;;  %2554 = vmatprep.subr.bf16.mxu0 %v2553_v39  ;;  %v1691_v39 = vld [vmem:[%s3786_s4 + $0x38] sm:$0xff]  ;;  %v2595_v12 = vpack.c.bf16 %v1686_v11, %v1684_v10  ;;  %v2629_v10 = vpack.c.bf16 %v1723_v45, %v1721_v54  ;;  %v1720_v11 = vld [vmem:[%s3786_s4 + $0x120] sm:$0xff]  ;;  %v2958_v45 = vmov 0  }
 0x48b   : > { %2522 = vmatprep.subr.bf16.mxu1 %v2521_v60  ;;  %v1578_v60 = vld [vmem:[#allocation6 + $0xe8] sm:$0xff]  ;;  %v2597_v13 = vpack.c.bf16 %v1691_v39, %v1689_v55  ;;  %v1722_v55 = vld [vmem:[%s3786_s4 + $0x130] sm:$0xff]  ;;  %v1838_v54 = vld [vmem:[%s3793_s11] sm:$0xf]  ;;  %2736 = vset.pattern.permute.xlu1 %v2958_v45 }
 0x48c   : > { %v2557_v52 = vpack.c.bf16 %v1580_v61, %v1578_v60  ;;  %2556 = vmatpush1.bf16.msra.mxu0 %v2555_v46  ;;  %v1688_v46 = vld [vmem:[%s3786_s4 + $0x20] sm:$0xff]  ;;  %v1690_v60 = vld [vmem:[%s3786_s4 + $0x30] sm:$0xff]  ;;  %v1725_v39 = vld [vmem:[%s3786_s4 + $0x148] sm:$0xff]  ;;  %2737 = vset.pattern.permute.xlu0 %v2958_v45 }
 0x48d   : > { %1871 = vperm.xlu1 %2736, %v1838_v54  }
 0x48e   : > { %2524 = vmatpush1.bf16.msra.mxu1 %v2523_v15  ;;  %v2559_v15 = vpack.c.bf16 %v1579_v14, %v1577_v58  ;;  %2558 = vmatprep.subr.bf16.mxu0 %v2557_v52  ;;  %v1693_v52 = vld [vmem:[%s3786_s4 + $0x48] sm:$0xff]  ;;  %v1695_v58 = vld [vmem:[%s3786_s4 + $0x58] sm:$0xff] }
 0x48f   : > { %2526 = vmatprep.subr.bf16.mxu1 %v2525_v44  ;;  %v1582_v44 = vld [vmem:[#allocation6 + $0x108] sm:$0xff] }
 0x490   : > { %v2561_v25 = vpack.c.bf16 %v1584_v23, %v1582_v44  ;;  %2560 = vmatpush1.bf16.msra.mxu0 %v2559_v15  ;;  %v2599_v15 = vpack.c.bf16 %v1690_v60, %v1688_v46  ;;  %v2601_v44 = vpack.c.bf16 %v1695_v58, %v1693_v52  ;;  %v1692_v23 = vld [vmem:[%s3786_s4 + $0x40] sm:$0xff]  ;;  %v1729_v52 = vld [vmem:[%s3786_s4 + $0x168] sm:$0xff]  ;;  %v1731_v58 = vld [vmem:[%s3786_s4 + $0x178] sm:$0xff] }
 0x491   : > { %v1724_v60 = vld [vmem:[%s3786_s4 + $0x140] sm:$0xff] }
 0x492   : > { %2528 = vmatpush1.bf16.msra.mxu1 %v2527_v62  ;;  %v1581_v62 = vld [vmem:[#allocation6 + $0x100] sm:$0xff]  ;;  %2562 = vmatprep.subr.bf16.mxu0 %v2561_v25  ;;  %v1694_v25 = vld [vmem:[%s3786_s4 + $0x50] sm:$0xff] }
 0x493   : > { %2594 = vmatprep.subr.bf16.mxu1 %v2593_v21  ;;  %v2563_v17 = vpack.c.bf16 %v1583_v16, %v1581_v62  ;;  %v2567_v21 = vpack.c.bf16 %v1587_v20, %v1585_v2  ;;  %v1697_v62 = vld [vmem:[%s3786_s4 + $0x68] sm:$0xff]  ;;  %v1699_v16 = vld [vmem:[%s3786_s4 + $0x78] sm:$0xff] }
 0x494   : > { %v2605_v18 = vpack.c.bf16 %v1699_v16, %v1697_v62  ;;  %v1701_v2 = vld [vmem:[%s3786_s4 + $0x88] sm:$0xff]  ;;  %v1703_v20 = vld [vmem:[%s3786_s4 + $0x98] sm:$0xff] }
 0x495   : > { %2564 = vmatpush1.bf16.msra.mxu0 %v2563_v17  ;;  %v2603_v17 = vpack.c.bf16 %v1694_v25, %v1692_v23  ;;  %v2609_v31 = vpack.c.bf16 %v1703_v20, %v1701_v2  ;;  %v1730_v23 = vld [vmem:[%s3786_s4 + $0x170] sm:$0xff]  ;;  %v1733_v25 = vld [vmem:[%s3786_s4 + $0x188] sm:$0xff]  ;;  %v1735_v62 = vld [vmem:[%s3786_s4 + $0x198] sm:$0xff] }
 0x496   : > { %2566 = vmatprep.subr.bf16.mxu0 %v2565_v30  ;;  %v1698_v30 = vld [vmem:[%s3786_s4 + $0x70] sm:$0xff]  ;;  %v1739_v2 = vld [vmem:[%s3786_s4 + $0x1b8] sm:$0xff] }
 0x499   : > { %2568 = vmatpush1.bf16.msra.mxu0 %v2567_v21  ;;  %v2607_v21 = vpack.c.bf16 %v1698_v30, %v1696_v29  ;;  %v1734_v29 = vld [vmem:[%s3786_s4 + $0x190] sm:$0xff]  ;;  %v1737_v30 = vld [vmem:[%s3786_s4 + $0x1a8] sm:$0xff] }
 0x49a   : > { %2570 = vmatprep.subr.bf16.mxu0 %v2569_v32  ;;  %v1702_v32 = vld [vmem:[%s3786_s4 + $0x90] sm:$0xff] }
 0x49d   : > { %2572 = vmatpush1.bf16.msra.mxu0 %v2571_v22  ;;  %v2611_v22 = vpack.c.bf16 %v1702_v32, %v1700_v3  ;;  %v1738_v3 = vld [vmem:[%s3786_s4 + $0x1b0] sm:$0xff]  ;;  %v1741_v32 = vld [vmem:[%s3786_s4 + $0x1c8] sm:$0xff] }
 0x49e   : > { %2574 = vmatprep.subr.bf16.mxu0 %v2573_v63  ;;  %v1706_v63 = vld [vmem:[%s3786_s4 + $0xb0] sm:$0xff] }
 0x4a1   : > { %2576 = vmatpush1.bf16.msra.mxu0 %v2575_v19  ;;  %v2615_v19 = vpack.c.bf16 %v1706_v63, %v1704_v28  ;;  %v1742_v28 = vld [vmem:[%s3786_s4 + $0x1d0] sm:$0xff] }
 0x4a2   : > { %2578 = vmatprep.subr.bf16.mxu0 %v2577_v35  ;;  %v1710_v35 = vld [vmem:[%s3786_s4 + $0xd0] sm:$0xff] }
 0x4a5   : > { %2580 = vmatpush1.bf16.msra.mxu0 %v2579_v48  ;;  %v2619_v48 = vpack.c.bf16 %v1710_v35, %v1708_v5  ;;  %v1747_v5 = vld [vmem:[%s3786_s4 + $0x1f8] sm:$0xff]  ;;  %v1609_v35 = vld [vmem:[#allocation6 + $0x1e0] sm:$0xff] }
 0x4a6   : > { %2582 = vmatprep.subr.bf16.mxu0 %v2581_v37  ;;  %v1714_v37 = vld [vmem:[%s3786_s4 + $0xf0] sm:$0xff] }
 0x4a9   : > { %2584 = vmatpush1.bf16.msra.mxu0 %v2583_v53  ;;  %v2623_v53 = vpack.c.bf16 %v1714_v37, %v1712_v36  ;;  %v1746_v36 = vld [vmem:[%s3786_s4 + $0x1f0] sm:$0xff] }
 0x4aa   : > { %2586 = vmatprep.subr.bf16.mxu0 %v2585_v43  ;;  %v1718_v43 = vld [vmem:[%s3786_s4 + $0x110] sm:$0xff] }
 0x4ad   : > { %2588 = vmatpush1.bf16.msra.mxu0 %v2587_v50  ;;  %v2627_v50 = vpack.c.bf16 %v1718_v43, %v1716_v38 }
 0x548   : > { %v1438_v61 = vpop.f32.mrb[4].mxu1 }
 0x549   : > { %1539 = vmatmul.mubr.f32.vlgmr.msra.gmra.mrb[6].mxu1 %v1438_v61  ;;  %v2288_v14 = vpop.f32.mrb[5].mxu1  ;;  %v1726_v61 = vld [vmem:[%s3786_s4 + $0x150] sm:$0xff] }
 0x54a   : > { %2596 = vmatpush1.bf16.msra.mxu1 %v2595_v12  ;;  %v1727_v12 = vld [vmem:[%s3786_s4 + $0x158] sm:$0xff]  ;;  %v2635_v14 = vpack.c.bf16 %v1726_v61, %v1724_v60 }
 0x54b   : > { %2598 = vmatprep.subr.bf16.mxu1 %v2597_v13  ;;  %v2631_v13 = vpack.c.bf16 %v1722_v55, %v1720_v11  ;;  %v2633_v46 = vpack.c.bf16 %v1727_v12, %v1725_v39 }
 0x54e   : > { %2600 = vmatpush1.bf16.msra.mxu1 %v2599_v15  ;;  %v2637_v15 = vpack.c.bf16 %v1731_v58, %v1729_v52  ;;  %v1840_v52 = vld [vmem:[%s3793_s11 + $0x8] sm:$0xf] }
 0x54f   : > { %2602 = vmatprep.subr.bf16.mxu1 %v2601_v44  ;;  %v1728_v44 = vld [vmem:[%s3786_s4 + $0x160] sm:$0xff] }
 0x550   : > { %v2639_v16 = vpack.c.bf16 %v1730_v23, %v1728_v44  ;;  %v2959_v23 = vmov 1966171168  }
 0x552   : > { %2604 = vmatpush1.bf16.msra.mxu1 %v2603_v17  ;;  %v2641_v17 = vpack.c.bf16 %v1735_v62, %v1733_v25  ;;  %v1846_v25 = vunpack.c.l.s4 %v2959_v23 }
 0x553   : > { %2606 = vmatprep.subr.bf16.mxu1 %v2605_v18  ;;  %v1732_v18 = vld [vmem:[%s3786_s4 + $0x180] sm:$0xff] }
 0x554   : > { %v2643_v20 = vpack.c.bf16 %v1734_v29, %v1732_v18  ;;  %v1847_v62 = vunpack.c.0.s8 %v1846_v25 }
 0x556   : > { %2608 = vmatpush1.bf16.msra.mxu1 %v2607_v21  ;;  %v2645_v21 = vpack.c.bf16 %v1739_v2, %v1737_v30  ;;  %v1850_v2 = vsub.s32 %v1847_v62, %v3538_v51 }
 0x557   : > { %2610 = vmatprep.subr.bf16.mxu1 %v2609_v31  ;;  %v1736_v31 = vld [vmem:[%s3786_s4 + $0x1a0] sm:$0xff] }
 0x558   : > { %v2647_v57 = vpack.c.bf16 %v1738_v3, %v1736_v31  ;;  %v1891_v31 = vsub.s32 0, %v3538_v51  ;;  %v1895_v3 = vsub.s32 1, %v3538_v51 }
 0x55a   : > { %2612 = vmatpush1.bf16.msra.mxu1 %v2611_v22  ;;  %v2649_v22 = vpack.c.bf16 %v1743_v56, %v1741_v32 }
 0x55b   : > { %2614 = vmatprep.subr.bf16.mxu1 %v2613_v27  ;;  %v1740_v27 = vld [vmem:[%s3786_s4 + $0x1c0] sm:$0xff] }
 0x55c   : > { %v2651_v63 = vpack.c.bf16 %v1742_v28, %v1740_v27 }
 0x55e   : > { %2616 = vmatpush1.bf16.msra.mxu1 %v2615_v19  ;;  %v1745_v19 = vld [vmem:[%s3786_s4 + $0x1e8] sm:$0xff] }
 0x55f   : > { %2618 = vmatprep.subr.bf16.mxu1 %v2617_v4  ;;  %v2589_v4 = vpack.c.bf16 %v1612_v34, %v1610_v0  ;;  %v2653_v42 = vpack.c.bf16 %v1747_v5, %v1745_v19 }
 0x561   : > { %2590 = vmatprep.subr.bf16.mxu0 %v2589_v4 }
 0x562   : > { %2620 = vmatpush1.bf16.msra.mxu1 %v2619_v48  ;;  %v2591_v48 = vpack.c.bf16 %v1611_v41, %v1609_v35 }
 0x563   : > { %2622 = vmatprep.subr.bf16.mxu1 %v2621_v7  ;;  %v1744_v7 = vld [vmem:[%s3786_s4 + $0x1e0] sm:$0xff] }
 0x564   : > { %v2655_v37 = vpack.c.bf16 %v1746_v36, %v1744_v7  ;;  %2592 = vmatpush1.bf16.msra.mxu0 %v2591_v48 }
 0x566   : > { %2624 = vmatpush1.bf16.msra.mxu1 %v2623_v53 }
 0x567   : > { %2626 = vmatprep.subr.bf16.mxu1 %v2625_v9 }
 0x56a   : > { %2628 = vmatpush1.bf16.msra.mxu1 %v2627_v50 }
 0x56b   : > { %2630 = vmatprep.subr.bf16.mxu1 %v2629_v10 }
 0x56e   : > { %2632 = vmatpush1.bf16.msra.mxu1 %v2631_v13 }
 0x56f   : > { %2634 = vmatprep.subr.bf16.mxu1 %v2633_v46 }
 0x572   : > { %2636 = vmatpush1.bf16.msra.mxu1 %v2635_v14 }
 0x573   : > { %2638 = vmatprep.subr.bf16.mxu1 %v2637_v15 }
 0x576   : > { %2640 = vmatpush1.bf16.msra.mxu1 %v2639_v16 }
 0x577   : > { %2642 = vmatprep.subr.bf16.mxu1 %v2641_v17 }
 0x57a   : > { %2644 = vmatpush1.bf16.msra.mxu1 %v2643_v20  ;;  %v1872_v20 = vpop.permute.xlu1 %1871 }
 0x57b   : > { %2646 = vmatprep.subr.bf16.mxu1 %v2645_v21 }
 0x57e   : > { %2648 = vmatpush1.bf16.msra.mxu1 %v2647_v57 }
 0x57f   : > { %2650 = vmatprep.subr.bf16.mxu1 %v2649_v22 }
 0x582   : > { %2652 = vmatpush1.bf16.msra.mxu1 %v2651_v63 }
 0x583   : > { %2654 = vmatprep.subr.bf16.mxu1 %v2653_v42 }
 0x586   : > { %2656 = vmatpush1.bf16.msra.mxu1 %v2655_v37 }
 0x61c   : > { %v1540_v8 = vpop.f32.mrb[6].mxu1 }
 0x61d   : > { %v1545_v49 = vmul.f32 %v1540_v8, %v3493_v40  ;;  %v1547_v53 = vmul.f32 %v1540_v8, %v3495_v1  ;;  %v1542_v9 = vpop.f32.mrb[7].mxu1  ;;  %v1839_v40 = vld [vmem:[%s3793_s11 + $0x4] sm:$0xf]  ;;  %v1841_v1 = vld [vmem:[%s3793_s11 + $0xc] sm:$0xf] }
 0x61e   : > { %v1546_v38 = vmul.f32 %v1542_v9, %v3501_v6  ;;  %v1548_v43 = vmul.f32 %v1542_v9, %v3503_v47  ;;  %1876 = vperm.xlu1 %2736, %v1839_v40  }
 0x620   : > { %1677 = vmatprep.mubr.f32.mxu0 %v1546_v38  ;;  %1812 = vmatprep.mubr.f32.mxu1 %v1548_v43 }
 0x621   : > { %1678 = vmatmul.mubr.f32.vlgmr.msra.gmra.mrb[8].mxu0 %v1545_v49  ;;  %1813 = vmatmul.mubr.f32.vlgmr.msra.gmra.mrb[8].mxu1 %v1547_v53 }
 0x622   : > { %1886 = vperm.xlu1 %2736, %v1841_v1  }
 0x69d   : > { %v1877_v28 = vpop.permute.xlu1 %1876 }
 0x6a1   : > { %v1887_v45 = vpop.permute.xlu1 %1886 }
 0x6f4   : > { %v1679_v6 = vpop.f32.mrb[8].mxu0  ;;  %v1814_v47 = vpop.f32.mrb[8].mxu1 }
 0x6f5   : > { %v1819_v50 = vsub.f32 %v1679_v6, %v1814_v47  ;;  %v1681_v10 = vpop.f32.mrb[9].mxu0  ;;  %v1816_v11 = vpop.f32.mrb[9].mxu1 }
 0x6f6   : > { %v1820_v55 = vsub.f32 %v1681_v10, %v1816_v11 }
 0x6f7   : > { %v1821_v39 = vsel %vm534_vm0, %v1819_v50, inf  ;;  %v1826_v46 = vsel %vm534_vm0, %v1819_v50, -inf }
 0x6f8   : > { %v1822_v12 = vsel %vm534_vm0, %v1820_v55, inf  ;;  %v1827_v60 = vsel %vm534_vm0, %v1820_v55, -inf }
 0x6f9   : > { %v1823_v13 = vmin.f32 %v1821_v39, %v1822_v12  ;;  %v1828_v61 = vmax.f32 %v1826_v46, %v1827_v60 }
 0x6fb   : > { %1824 = vmin.xlane.f32.xlu0 %v1823_v13 }
 0x6ff   : > { %1829 = vmax.xlane.f32.xlu0 %v1828_v61 }
 0x715   : > { %1881 = vperm.xlu0 %2737, %v1840_v52  }
 0x788   : > { %v1825_v58 = vpop.xlane.xlu0 %1824 }
 0x789   : > { %v1831_v16 = vsub.f32 %v1819_v50, %v1825_v58  ;;  %v1832_v17 = vsub.f32 %v1820_v55, %v1825_v58 }
 0x78c   : > { %v1830_v14 = vpop.xlane.xlu0 %1829 }
 0x78d   : > { %v1833_v15 = vsub.f32 %v1830_v14, %v1825_v58 }
 0x78f   : > { %v1834_v44 = vadd.f32 1e-12, %v1833_v15 }
 0x791   : > { %2750 = vrcp.f32 %v1834_v44 }
 0x794   : > { %v1882_v35 = vpop.permute.xlu0 %1881 }
 0x79b   : > { %v2751_v18 = vpop.eup %2750 }
 0x79c   : > { %v1836_v29 = vmul.f32 %v2751_v18, %v1831_v16  ;;  %v1837_v30 = vmul.f32 %v2751_v18, %v1832_v17 }
 0x79e   : > { %v1844_v21 = vcombine.low %v1836_v29, %v1837_v30 }
 0x7a0   : > { %v1851_v32 = vrot.slane %v1844_v21, %v1850_v2 }
 0x7a2   : > { %v1859_v56 = vrot.slane %v1851_v32, %v1850_v2  ;;  %v1852_v57 = vcombine.high %v1851_v32, %v1851_v32 }
 0x7a4   : > { %v1892_v22 = vrot.slane %v1859_v56, %v1891_v31  ;;  %v1896_v27 = vrot.slane %v1859_v56, %v1895_v3  ;;  %v1866_v63 = vrot.slane %v1852_v57, %v1850_v2  ;;  %v1867_v0 = vcombine.high %v1859_v56, %v1859_v56 }
 0x7a6   : > { %v1929_v34 = vmul.f32 %v1892_v22, %v1872_v20  ;;  %v1930_v19 = vmul.f32 %v1896_v27, %v1872_v20  ;;  %v1900_v4 = vrot.slane %v1866_v63, %v1891_v31  ;;  %v1904_v5 = vrot.slane %v1866_v63, %v1895_v3 }
 0x7a7   : > { %v1868_v41 = vcombine.high %v1866_v63, %v1866_v63  ;;  %v1908_v42 = vrot.slane %v1867_v0, %v1891_v31  ;;  %v1912_v48 = vrot.slane %v1867_v0, %v1895_v3 }
 0x7a8   : > { %v1937_v7 = vadd.f32 1.0, %v1929_v34  ;;  %v1938_v36 = vadd.f32 1.0, %v1930_v19  ;;  %v1931_v37 = vmul.f32 %v1900_v4, %v1877_v28  ;;  %v1932_v51 = vmul.f32 %v1904_v5, %v1877_v28 }
 0x7a9   : > { %v1916_v8 = vrot.slane %v1868_v41, %v1891_v31  ;;  %v1920_v49 = vrot.slane %v1868_v41, %v1895_v3  ;;  %v1933_v53 = vmul.f32 %v1908_v42, %v1882_v35  ;;  %v1934_v9 = vmul.f32 %v1912_v48, %v1882_v35 }
 0x7aa   : > { %v1953_v38 = vcombine.low %v1937_v7, %v1938_v36  ;;  %v1939_v43 = vadd.f32 1.0, %v1931_v37  ;;  %v1940_v54 = vadd.f32 1.0, %v1932_v51 }
 0x7ab   : > { %v1935_v40 = vmul.f32 %v1916_v8, %v1887_v45  ;;  %v1936_v1 = vmul.f32 %v1920_v49, %v1887_v45  ;;  %v1941_v6 = vadd.f32 1.0, %v1933_v53  ;;  %v1942_v47 = vadd.f32 1.0, %v1934_v9 }
 0x7ac   : > { %v1954_v50 = vcombine.low %v1939_v43, %v1940_v54  ;;  %v1961_v39 = vmul.f32 %v1953_v38, %v3401_v24 }
 0x7ad   : > { %v1943_v10 = vadd.f32 1.0, %v1935_v40  ;;  %v1944_v11 = vadd.f32 1.0, %v1936_v1  ;;  %v1955_v55 = vcombine.low %v1941_v6, %v1942_v47 }
 0x7ae   : > { %v1962_v12 = vmul.f32 %v1954_v50, %v3403_v59 }
 0x7af   : > { %v1956_v13 = vcombine.low %v1943_v10, %v1944_v11  ;;  %v1963_v52 = vmul.f32 %v1955_v55, %v3448_v26 }
 0x7b0   : > { %v1969_v46 = vcombine.low %v1961_v39, %v1962_v12  ;;  %v1970_v60 = vcombine.high %v1961_v39, %v1962_v12 }
 0x7b1   : > { %v1964_v61 = vmul.f32 %v1956_v13, %v3454_v33 }
 0x7b2   : > { %1977 = vst [vmem:[%s508_s17] sm:$0xff] %v1969_v46  ;;  %1978 = vst [vmem:[%s508_s17 + $0x8] sm:$0xff] %v1970_v60 }
 0x7b3   : > { %v1971_v58 = vcombine.low %v1963_v52, %v1964_v61  ;;  %v1972_v14 = vcombine.high %v1963_v52, %v1964_v61 }
 0x7b5   : > { %1979 = vst [vmem:[%s508_s17 + $0x10] sm:$0xff] %v1971_v58  ;;  %1980 = vst [vmem:[%s508_s17 + $0x18] sm:$0xff] %v1972_v14 }
 0x7b6 PF: > { %s26_s21 = sadd.s32 1, %s2942_s21  }
 0x7b7   : > { %p23_p3 = scmp.ge.s32.totalorder %s26_s21, 4  }
 0x7b9   :  { %25 = sbr.rel (!%p23_p3) target bundleno = 7 (0x7), region = 123 }
 0x7c0   :  { %2005 = vsyncpa [#allocation3], 1 }
 0x7c1   :  { %2007 = vsyncpa [#allocation3 + $0x1], 1 }
 0x7c2   :  { %2008 = vsyncpa [#allocation5], 1 }
 0x7c3   :  { %2009 = vsyncpa [#allocation8], 1 }
 0x7c4   :  { %2010 = vsyncpa [#allocation11], 1 }

</bundles_post_ra>
